<compile_context>
chip_gen: v5e
topology: v5e:2x2
jax: 0.10.0
libtpu: 0.0.40
codegen_flags: <defaults>
</compile_context>

<pallas_src>
import jax
import jax.numpy as jnp
from jax import lax
from jax.experimental import pallas as pl
from jax.experimental.pallas import tpu as pltpu
import numpy as np


def _round_up(x, m):
    return (x + m - 1) // m * m


def bottleneck_kernel(x_ref, w1_ref, b1_ref, w2_ref, b2_ref, w3_ref,
                      out_ref, pad_ref):
    """Fused: conv1(1x1)+bn1+relu -> conv2(3x3,p=1)+bn2+relu -> conv3(1x1)
              -> +residual -> relu.   One image per grid step.
       All channel dims are already lane-padded to multiples of 128 and the
       BN scales are pre-folded into w1 / w2 (biases b1 / b2 remain)."""
    _, H, W, Cin = x_ref.shape
    C0 = w1_ref.shape[1]          # padded cfg[0]
    C1 = w2_ref.shape[2]          # padded cfg[1]
    C2 = w3_ref.shape[1]          # padded cfg[2] (== Cin)

    x = x_ref[0]                                        # (H, W, Cin) f32
    xm = x.reshape(H * W, Cin)

    # ---- conv1 (1x1, bn1 scale folded) + bias + relu ------------------------
    t1 = jnp.dot(xm.astype(jnp.bfloat16), w1_ref[...],
                 preferred_element_type=jnp.float32)
    t1 = jnp.maximum(t1 + b1_ref[...], 0.0)             # (H*W, C0) f32

    # ---- conv2 (3x3, stride 1, pad 1, bn2 scale folded) + bias + relu -------
    # Zero only the 1-wide halo border (interior is overwritten every step).
    zrow = jnp.zeros((1, W + 2, C0), jnp.float32)
    pad_ref[0:1, :, :] = zrow
    pad_ref[H + 1:H + 2, :, :] = zrow
    zcol = jnp.zeros((H, 1, C0), jnp.float32)
    pad_ref[1:H + 1, 0:1, :] = zcol
    pad_ref[1:H + 1, W + 1:W + 2, :] = zcol
    pad_ref[1:H + 1, 1:W + 1, :] = t1.reshape(H, W, C0)

    # 3 matmuls (one per ky); the 3 kx taps are concatenated on the lane axis
    # (each tap is a multiple of 128 lanes, so the concat is lane-aligned) and
    # contracted in a single K = 3*C0 matmul against w2[ky] of shape (3*C0, C1).
    acc = jnp.zeros((H * W, C1), jnp.float32)
    for ky in range(3):
        patch = jnp.concatenate(
            [pad_ref[ky:ky + H, 0:W, :],
             pad_ref[ky:ky + H, 1:W + 1, :],
             pad_ref[ky:ky + H, 2:W + 2, :]], axis=2)    # (H, W, 3*C0)
        acc += jnp.dot(patch.reshape(H * W, 3 * C0).astype(jnp.bfloat16),
                       w2_ref[ky], preferred_element_type=jnp.float32)
    t2 = jnp.maximum(acc + b2_ref[...], 0.0)             # (H*W, C1) f32

    # ---- conv3 (1x1), residual add, relu (module has no bn3) ----------------
    t3 = jnp.dot(t2.astype(jnp.bfloat16), w3_ref[...],
                 preferred_element_type=jnp.float32)
    out = jnp.maximum(t3.reshape(H, W, C2) + x, 0.0)
    out_ref[0] = out.astype(out_ref.dtype)


def fold_and_pack_params(w1_t, g1, be1, rm1, rv1,
                         w2_t, g2, be2, rm2, rv2, w3_t, eps=1e-5):
    """PyTorch OIHW conv weights + BN params -> kernel layout:
       BN scales folded into conv weights, channels lane-padded to multiples
       of 128, matmul operands cast to bf16 (biases stay f32)."""
    C0, Cin = w1_t.shape[0], w1_t.shape[1]
    C1 = w2_t.shape[0]
    C2 = w3_t.shape[0]
    Cinp, C0p, C1p, C2p = (_round_up(c, 128) for c in (Cin, C0, C1, C2))

    s1 = g1 / jnp.sqrt(rv1 + eps)
    b1 = be1 - rm1 * s1
    s2 = g2 / jnp.sqrt(rv2 + eps)
    b2 = be2 - rm2 * s2

    # conv1: (C0, Cin, 1, 1) -> (Cin, C0), fold bn1 scale over output channels.
    w1 = jnp.transpose(w1_t[:, :, 0, 0], (1, 0)) * s1[None, :]
    w1 = jnp.pad(w1, ((0, Cinp - Cin), (0, C0p - C0))).astype(jnp.bfloat16)
    b1 = jnp.pad(b1, (0, C0p - C0)).reshape(1, C0p).astype(jnp.float32)

    # conv2: (C1, C0, 3, 3) -> (kh, kw, C0, C1), fold bn2 scale, pad channels,
    # then collapse (kw, C0) -> K so each ky needs a single matmul.
    w2 = jnp.transpose(w2_t, (2, 3, 1, 0)) * s2[None, None, None, :]
    w2 = jnp.pad(w2, ((0, 0), (0, 0), (0, C0p - C0), (0, C1p - C1)))
    w2 = w2.reshape(3, 3 * C0p, C1p).astype(jnp.bfloat16)
    b2 = jnp.pad(b2, (0, C1p - C1)).reshape(1, C1p).astype(jnp.float32)

    # conv3: (C2, C1, 1, 1) -> (C1, C2).  No bn3 in the module.
    w3 = jnp.transpose(w3_t[:, :, 0, 0], (1, 0))
    w3 = jnp.pad(w3, ((0, C1p - C1), (0, C2p - C2))).astype(jnp.bfloat16)

    return w1, b1, w2, b2, w3


def bottleneck_pallas(x_nchw, w1, b1, w2, b2, w3):
    """x_nchw: (N, Cin, H, W) float32.  Weights from fold_and_pack_params."""
    N, Cin, H, W = x_nchw.shape
    Cinp, C0p = w1.shape
    C1p = w2.shape[2]
    C2p = w3.shape[1]
    assert C2p == Cinp, "downsample=None requires cfg[2] == inplanes"

    x = jnp.transpose(x_nchw, (0, 2, 3, 1))                       # NHWC
    x = jnp.pad(x, ((0, 0), (0, 0), (0, 0), (0, Cinp - Cin)))     # lane-dense

    out_nhwc = pl.pallas_call(
        bottleneck_kernel,
        out_shape=jax.ShapeDtypeStruct((N, H, W, C2p), jnp.float32),
        grid=(N,),
        in_specs=[
            pl.BlockSpec((1, H, W, Cinp), lambda n: (n, 0, 0, 0)),
            pl.BlockSpec((Cinp, C0p), lambda n: (0, 0)),
            pl.BlockSpec((1, C0p), lambda n: (0, 0)),
            pl.BlockSpec((3, 3 * C0p, C1p), lambda n: (0, 0, 0)),
            pl.BlockSpec((1, C1p), lambda n: (0, 0)),
            pl.BlockSpec((C1p, C2p), lambda n: (0, 0)),
        ],
        out_specs=pl.BlockSpec((1, H, W, C2p), lambda n: (n, 0, 0, 0)),
        scratch_shapes=[pltpu.VMEM((H + 2, W + 2, C0p), jnp.float32)],
        compiler_params=pltpu.CompilerParams(
            dimension_semantics=("parallel",),
            vmem_limit_bytes=32 * 1024 * 1024),
    )(x, w1, b1, w2, b2, w3)

    out_nhwc = out_nhwc[..., :Cin]                                # drop padding
    return jnp.transpose(out_nhwc, (0, 3, 1, 2))                  # NCHW


def bottleneck_reference(x, w1_t, g1, be1, rm1, rv1,
                         w2_t, g2, be2, rm2, rv2, w3_t, eps=1e-5):
    """Pure-JAX f32 reference mirroring the PyTorch forward (NCHW / OIHW)."""
    dn = ("NCHW", "OIHW", "NCHW")

    def bn(y, g, be, rm, rv):
        c = y.shape[1]
        return ((y - rm.reshape(1, c, 1, 1))
                / jnp.sqrt(rv.reshape(1, c, 1, 1) + eps)
                * g.reshape(1, c, 1, 1) + be.reshape(1, c, 1, 1))

    out = lax.conv_general_dilated(x, w1_t, (1, 1), "VALID",
                                   dimension_numbers=dn)
    out = jnp.maximum(bn(out, g1, be1, rm1, rv1), 0.0)
    out = lax.conv_general_dilated(out, w2_t, (1, 1), ((1, 1), (1, 1)),
                                   dimension_numbers=dn)
    out = jnp.maximum(bn(out, g2, be2, rm2, rv2), 0.0)
    out = lax.conv_general_dilated(out, w3_t, (1, 1), "VALID",
                                   dimension_numbers=dn)
    return jnp.maximum(out + x, 0.0)


if __name__ == "__main__":
    # Small, deterministic problem: inplanes=8, cfg=[4, 4, 8], 16x16 spatial.
    N, inplanes, H, W = 2, 8, 16, 16
    cfg = (4, 4, 8)
    eps = 1e-5

    keys = jax.random.split(jax.random.PRNGKey(0), 12)
    x = jax.random.normal(keys[0], (N, inplanes, H, W), jnp.float32)

    # PyTorch-layout parameters (OIHW conv weights, per-channel BN stats).
    w1_t = jax.random.normal(keys[1], (cfg[0], inplanes, 1, 1), jnp.float32) * 0.2
    w2_t = jax.random.normal(keys[2], (cfg[1], cfg[0], 3, 3), jnp.float32) * 0.2
    w3_t = jax.random.normal(keys[3], (cfg[2], cfg[1], 1, 1), jnp.float32) * 0.2

    g1 = jax.random.uniform(keys[4], (cfg[0],), jnp.float32, 0.5, 1.5)
    be1 = jax.random.normal(keys[5], (cfg[0],), jnp.float32) * 0.1
    rm1 = jax.random.normal(keys[6], (cfg[0],), jnp.float32) * 0.1
    rv1 = jax.random.uniform(keys[7], (cfg[0],), jnp.float32, 0.5, 1.5)

    g2 = jax.random.uniform(keys[8], (cfg[1],), jnp.float32, 0.5, 1.5)
    be2 = jax.random.normal(keys[9], (cfg[1],), jnp.float32) * 0.1
    rm2 = jax.random.normal(keys[10], (cfg[1],), jnp.float32) * 0.1
    rv2 = jax.random.uniform(keys[11], (cfg[1],), jnp.float32, 0.5, 1.5)

    params = fold_and_pack_params(w1_t, g1, be1, rm1, rv1,
                                  w2_t, g2, be2, rm2, rv2, w3_t, eps)

    run = jax.jit(bottleneck_pallas)
    out = run(x, *params)
    out = jax.block_until_ready(out)

    ref = bottleneck_reference(x, w1_t, g1, be1, rm1, rv1,
                               w2_t, g2, be2, rm2, rv2, w3_t, eps)
    # Tolerance reflects the deliberate bf16-operand MXU matmuls (f32 accum);
    # observed error is well under this bound.
    np.testing.assert_allclose(np.asarray(out), np.asarray(ref),
                               rtol=2e-2, atol=5e-2)

    print("KERNEL_OK")
</pallas_src>

<mosaic_0001>
module attributes {stable_mosaic.version = 11 : i64} {
  func.func @bottleneck_kernel(%arg0: i32, %arg1: memref<1x16x16x128xf32, #tpu.memory_space<vmem>>, %arg2: memref<128x128xbf16, #tpu.memory_space<vmem>>, %arg3: memref<1x128xf32, #tpu.memory_space<vmem>>, %arg4: memref<3x384x128xbf16, #tpu.memory_space<vmem>>, %arg5: memref<1x128xf32, #tpu.memory_space<vmem>>, %arg6: memref<128x128xbf16, #tpu.memory_space<vmem>>, %arg7: memref<1x16x16x128xf32, #tpu.memory_space<vmem>>, %arg8: memref<18x18x128xf32, #tpu.memory_space<vmem>>) attributes {dimension_semantics = [#tpu.dimension_semantics<parallel>], iteration_bounds = array<i64: 2>, scalar_prefetch = 0 : i64, scratch_operands = 1 : i64, tpu.core_type = #tpu.core_type<tc>, window_params = [{transform_indices = @transform_0, window_bounds = array<i64: 1, 16, 16, 128>}, {pipeline_mode = #tpu.pipeline_mode<synchronous>, transform_indices = @transform_1, window_bounds = array<i64: 128, 128>}, {pipeline_mode = #tpu.pipeline_mode<synchronous>, transform_indices = @transform_2, window_bounds = array<i64: 1, 128>}, {pipeline_mode = #tpu.pipeline_mode<synchronous>, transform_indices = @transform_3, window_bounds = array<i64: 3, 384, 128>}, {pipeline_mode = #tpu.pipeline_mode<synchronous>, transform_indices = @transform_4, window_bounds = array<i64: 1, 128>}, {pipeline_mode = #tpu.pipeline_mode<synchronous>, transform_indices = @transform_5, window_bounds = array<i64: 128, 128>}, {transform_indices = @transform_6, window_bounds = array<i64: 1, 16, 16, 128>}]} {
    %c0 = arith.constant 0 : index
    %c0_0 = arith.constant 0 : index
    %c0_1 = arith.constant 0 : index
    %c0_2 = arith.constant 0 : index
    %0 = vector.load %arg1[%c0, %c0_0, %c0_1, %c0_2] : memref<1x16x16x128xf32, #tpu.memory_space<vmem>>, vector<1x16x16x128xf32>
    %1 = vector.shape_cast %0 : vector<1x16x16x128xf32> to vector<16x16x128xf32>
    %2 = vector.shape_cast %1 : vector<16x16x128xf32> to vector<256x128xf32>
    %3 = arith.truncf %2 : vector<256x128xf32> to vector<256x128xbf16>
    %c0_3 = arith.constant 0 : index
    %c0_4 = arith.constant 0 : index
    %4 = vector.load %arg2[%c0_3, %c0_4] : memref<128x128xbf16, #tpu.memory_space<vmem>>, vector<128x128xbf16>
    %cst = arith.constant dense<0.000000e+00> : vector<256x128xf32>
    %5 = tpu.matmul %3, %4, %cst {dimension_numbers = #tpu.dot_dimension_numbers<[1], [0], [0], [1], [0, 0, 1, 1], [], []>} : vector<256x128xbf16>, vector<128x128xbf16>, vector<256x128xf32> -> vector<256x128xf32>
    %c0_5 = arith.constant 0 : index
    %c0_6 = arith.constant 0 : index
    %6 = vector.load %arg3[%c0_5, %c0_6] : memref<1x128xf32, #tpu.memory_space<vmem>>, vector<1x128xf32>
    %7 = vector.broadcast %6 : vector<1x128xf32> to vector<256x128xf32>
    %8 = arith.addf %5, %7 : vector<256x128xf32>
    %cst_7 = arith.constant 0.000000e+00 : f32
    %9 = vector.broadcast %cst_7 : f32 to vector<256x128xf32>
    %10 = arith.maximumf %8, %9 : vector<256x128xf32>
    %cst_8 = arith.constant 0.000000e+00 : f32
    %11 = vector.broadcast %cst_8 : f32 to vector<1x18x128xf32>
    %c0_9 = arith.constant 0 : index
    %c0_10 = arith.constant 0 : index
    %c0_11 = arith.constant 0 : index
    %12 = vector.load %arg8[%c0_9, %c0_10, %c0_11] : memref<18x18x128xf32, #tpu.memory_space<vmem>>, vector<1x18x128xf32>
    tpu.vector_store %arg8[%c0_9, %c0_10, %c0_11], %11 {strides = array<i32>} : memref<18x18x128xf32, #tpu.memory_space<vmem>>, vector<1x18x128xf32>,
    %c17 = arith.constant 17 : index
    %c0_12 = arith.constant 0 : index
    %c0_13 = arith.constant 0 : index
    %13 = vector.load %arg8[%c17, %c0_12, %c0_13] : memref<18x18x128xf32, #tpu.memory_space<vmem>>, vector<1x18x128xf32>
    tpu.vector_store %arg8[%c17, %c0_12, %c0_13], %11 {strides = array<i32>} : memref<18x18x128xf32, #tpu.memory_space<vmem>>, vector<1x18x128xf32>,
    %cst_14 = arith.constant 0.000000e+00 : f32
    %14 = vector.broadcast %cst_14 : f32 to vector<16x1x128xf32>
    %c1 = arith.constant 1 : index
    %c0_15 = arith.constant 0 : index
    %c0_16 = arith.constant 0 : index
    %15 = vector.load %arg8[%c1, %c0_15, %c0_16] : memref<18x18x128xf32, #tpu.memory_space<vmem>>, vector<16x1x128xf32>
    tpu.vector_store %arg8[%c1, %c0_15, %c0_16], %14 {strides = array<i32>} : memref<18x18x128xf32, #tpu.memory_space<vmem>>, vector<16x1x128xf32>,
    %c1_17 = arith.constant 1 : index
    %c17_18 = arith.constant 17 : index
    %c0_19 = arith.constant 0 : index
    %16 = vector.load %arg8[%c1_17, %c17_18, %c0_19] : memref<18x18x128xf32, #tpu.memory_space<vmem>>, vector<16x1x128xf32>
    tpu.vector_store %arg8[%c1_17, %c17_18, %c0_19], %14 {strides = array<i32>} : memref<18x18x128xf32, #tpu.memory_space<vmem>>, vector<16x1x128xf32>,
    %17 = vector.shape_cast %10 : vector<256x128xf32> to vector<16x16x128xf32>
    %c1_20 = arith.constant 1 : index
    %c1_21 = arith.constant 1 : index
    %c0_22 = arith.constant 0 : index
    %18 = vector.load %arg8[%c1_20, %c1_21, %c0_22] : memref<18x18x128xf32, #tpu.memory_space<vmem>>, vector<16x16x128xf32>
    tpu.vector_store %arg8[%c1_20, %c1_21, %c0_22], %17 {strides = array<i32>} : memref<18x18x128xf32, #tpu.memory_space<vmem>>, vector<16x16x128xf32>,
    %cst_23 = arith.constant 0.000000e+00 : f32
    %19 = vector.broadcast %cst_23 : f32 to vector<256x128xf32>
    %c0_24 = arith.constant 0 : index
    %c0_25 = arith.constant 0 : index
    %c0_26 = arith.constant 0 : index
    %20 = vector.load %arg8[%c0_24, %c0_25, %c0_26] : memref<18x18x128xf32, #tpu.memory_space<vmem>>, vector<16x16x128xf32>
    %c0_27 = arith.constant 0 : index
    %c1_28 = arith.constant 1 : index
    %c0_29 = arith.constant 0 : index
    %21 = vector.load %arg8[%c0_27, %c1_28, %c0_29] : memref<18x18x128xf32, #tpu.memory_space<vmem>>, vector<16x16x128xf32>
    %c0_30 = arith.constant 0 : index
    %c2 = arith.constant 2 : index
    %c0_31 = arith.constant 0 : index
    %22 = vector.load %arg8[%c0_30, %c2, %c0_31] : memref<18x18x128xf32, #tpu.memory_space<vmem>>, vector<16x16x128xf32>
    %23 = tpu.concatenate %20, %21, %22 in 2 : vector<16x16x128xf32>, vector<16x16x128xf32>, vector<16x16x128xf32> -> vector<16x16x384xf32>
    %24 = vector.shape_cast %23 : vector<16x16x384xf32> to vector<256x384xf32>
    %25 = arith.truncf %24 : vector<256x384xf32> to vector<256x384xbf16>
    %c0_32 = arith.constant 0 : index
    %c0_33 = arith.constant 0 : index
    %c0_34 = arith.constant 0 : index
    %26 = vector.load %arg4[%c0_32, %c0_33, %c0_34] : memref<3x384x128xbf16, #tpu.memory_space<vmem>>, vector<1x384x128xbf16>
    %27 = vector.shape_cast %26 : vector<1x384x128xbf16> to vector<384x128xbf16>
    %cst_35 = arith.constant dense<0.000000e+00> : vector<256x128xf32>
    %28 = tpu.matmul %25, %27, %cst_35 {dimension_numbers = #tpu.dot_dimension_numbers<[1], [0], [0], [1], [0, 0, 1, 1], [], []>} : vector<256x384xbf16>, vector<384x128xbf16>, vector<256x128xf32> -> vector<256x128xf32>
    %29 = arith.addf %19, %28 : vector<256x128xf32>
    %c1_36 = arith.constant 1 : index
    %c0_37 = arith.constant 0 : index
    %c0_38 = arith.constant 0 : index
    %30 = vector.load %arg8[%c1_36, %c0_37, %c0_38] : memref<18x18x128xf32, #tpu.memory_space<vmem>>, vector<16x16x128xf32>
    %c1_39 = arith.constant 1 : index
    %c1_40 = arith.constant 1 : index
    %c0_41 = arith.constant 0 : index
    %31 = vector.load %arg8[%c1_39, %c1_40, %c0_41] : memref<18x18x128xf32, #tpu.memory_space<vmem>>, vector<16x16x128xf32>
    %c1_42 = arith.constant 1 : index
    %c2_43 = arith.constant 2 : index
    %c0_44 = arith.constant 0 : index
    %32 = vector.load %arg8[%c1_42, %c2_43, %c0_44] : memref<18x18x128xf32, #tpu.memory_space<vmem>>, vector<16x16x128xf32>
    %33 = tpu.concatenate %30, %31, %32 in 2 : vector<16x16x128xf32>, vector<16x16x128xf32>, vector<16x16x128xf32> -> vector<16x16x384xf32>
    %34 = vector.shape_cast %33 : vector<16x16x384xf32> to vector<256x384xf32>
    %35 = arith.truncf %34 : vector<256x384xf32> to vector<256x384xbf16>
    %c1_45 = arith.constant 1 : index
    %c0_46 = arith.constant 0 : index
    %c0_47 = arith.constant 0 : index
    %36 = vector.load %arg4[%c1_45, %c0_46, %c0_47] : memref<3x384x128xbf16, #tpu.memory_space<vmem>>, vector<1x384x128xbf16>
    %37 = vector.shape_cast %36 : vector<1x384x128xbf16> to vector<384x128xbf16>
    %cst_48 = arith.constant dense<0.000000e+00> : vector<256x128xf32>
    %38 = tpu.matmul %35, %37, %cst_48 {dimension_numbers = #tpu.dot_dimension_numbers<[1], [0], [0], [1], [0, 0, 1, 1], [], []>} : vector<256x384xbf16>, vector<384x128xbf16>, vector<256x128xf32> -> vector<256x128xf32>
    %39 = arith.addf %29, %38 : vector<256x128xf32>
    %c2_49 = arith.constant 2 : index
    %c0_50 = arith.constant 0 : index
    %c0_51 = arith.constant 0 : index
    %40 = vector.load %arg8[%c2_49, %c0_50, %c0_51] : memref<18x18x128xf32, #tpu.memory_space<vmem>>, vector<16x16x128xf32>
    %c2_52 = arith.constant 2 : index
    %c1_53 = arith.constant 1 : index
    %c0_54 = arith.constant 0 : index
    %41 = vector.load %arg8[%c2_52, %c1_53, %c0_54] : memref<18x18x128xf32, #tpu.memory_space<vmem>>, vector<16x16x128xf32>
    %c2_55 = arith.constant 2 : index
    %c2_56 = arith.constant 2 : index
    %c0_57 = arith.constant 0 : index
    %42 = vector.load %arg8[%c2_55, %c2_56, %c0_57] : memref<18x18x128xf32, #tpu.memory_space<vmem>>, vector<16x16x128xf32>
    %43 = tpu.concatenate %40, %41, %42 in 2 : vector<16x16x128xf32>, vector<16x16x128xf32>, vector<16x16x128xf32> -> vector<16x16x384xf32>
    %44 = vector.shape_cast %43 : vector<16x16x384xf32> to vector<256x384xf32>
    %45 = arith.truncf %44 : vector<256x384xf32> to vector<256x384xbf16>
    %c2_58 = arith.constant 2 : index
    %c0_59 = arith.constant 0 : index
    %c0_60 = arith.constant 0 : index
    %46 = vector.load %arg4[%c2_58, %c0_59, %c0_60] : memref<3x384x128xbf16, #tpu.memory_space<vmem>>, vector<1x384x128xbf16>
    %47 = vector.shape_cast %46 : vector<1x384x128xbf16> to vector<384x128xbf16>
    %cst_61 = arith.constant dense<0.000000e+00> : vector<256x128xf32>
    %48 = tpu.matmul %45, %47, %cst_61 {dimension_numbers = #tpu.dot_dimension_numbers<[1], [0], [0], [1], [0, 0, 1, 1], [], []>} : vector<256x384xbf16>, vector<384x128xbf16>, vector<256x128xf32> -> vector<256x128xf32>
    %49 = arith.addf %39, %48 : vector<256x128xf32>
    %c0_62 = arith.constant 0 : index
    %c0_63 = arith.constant 0 : index
    %50 = vector.load %arg5[%c0_62, %c0_63] : memref<1x128xf32, #tpu.memory_space<vmem>>, vector<1x128xf32>
    %51 = vector.broadcast %50 : vector<1x128xf32> to vector<256x128xf32>
    %52 = arith.addf %49, %51 : vector<256x128xf32>
    %cst_64 = arith.constant 0.000000e+00 : f32
    %53 = vector.broadcast %cst_64 : f32 to vector<256x128xf32>
    %54 = arith.maximumf %52, %53 : vector<256x128xf32>
    %55 = arith.truncf %54 : vector<256x128xf32> to vector<256x128xbf16>
    %c0_65 = arith.constant 0 : index
    %c0_66 = arith.constant 0 : index
    %56 = vector.load %arg6[%c0_65, %c0_66] : memref<128x128xbf16, #tpu.memory_space<vmem>>, vector<128x128xbf16>
    %cst_67 = arith.constant dense<0.000000e+00> : vector<256x128xf32>
    %57 = tpu.matmul %55, %56, %cst_67 {dimension_numbers = #tpu.dot_dimension_numbers<[1], [0], [0], [1], [0, 0, 1, 1], [], []>} : vector<256x128xbf16>, vector<128x128xbf16>, vector<256x128xf32> -> vector<256x128xf32>
    %58 = vector.shape_cast %57 : vector<256x128xf32> to vector<16x16x128xf32>
    %59 = arith.addf %58, %1 : vector<16x16x128xf32>
    %cst_68 = arith.constant 0.000000e+00 : f32
    %60 = vector.broadcast %cst_68 : f32 to vector<16x16x128xf32>
    %61 = arith.maximumf %59, %60 : vector<16x16x128xf32>
    %c0_69 = arith.constant 0 : index
    %c0_70 = arith.constant 0 : index
    %c0_71 = arith.constant 0 : index
    %c0_72 = arith.constant 0 : index
    %62 = vector.load %arg7[%c0_69, %c0_70, %c0_71, %c0_72] : memref<1x16x16x128xf32, #tpu.memory_space<vmem>>, vector<1x16x16x128xf32>
    %63 = vector.shape_cast %62 : vector<1x16x16x128xf32> to vector<16x16x128xf32>
    %64 = vector.shape_cast %61 : vector<16x16x128xf32> to vector<1x16x16x128xf32>
    tpu.vector_store %arg7[%c0_69, %c0_70, %c0_71, %c0_72], %64 {strides = array<i32>} : memref<1x16x16x128xf32, #tpu.memory_space<vmem>>, vector<1x16x16x128xf32>,
    return
  }
  func.func @transform_0(%arg0: i32) -> (i32, i32, i32, i32) {
    %c0_i32 = arith.constant 0 : i32
    %c0_i32_0 = arith.constant 0 : i32
    %c0_i32_1 = arith.constant 0 : i32
    %c0_i32_2 = arith.constant 0 : i32
    return %arg0, %c0_i32, %c0_i32_0, %c0_i32_1 : i32, i32, i32, i32
  }
  func.func @transform_1(%arg0: i32) -> (i32, i32) {
    %c0_i32 = arith.constant 0 : i32
    %c0_i32_0 = arith.constant 0 : i32
    %c0_i32_1 = arith.constant 0 : i32
    return %c0_i32, %c0_i32_0 : i32, i32
  }
  func.func @transform_2(%arg0: i32) -> (i32, i32) {
    %c0_i32 = arith.constant 0 : i32
    %c0_i32_0 = arith.constant 0 : i32
    %c0_i32_1 = arith.constant 0 : i32
    return %c0_i32, %c0_i32_0 : i32, i32
  }
  func.func @transform_3(%arg0: i32) -> (i32, i32, i32) {
    %c0_i32 = arith.constant 0 : i32
    %c0_i32_0 = arith.constant 0 : i32
    %c0_i32_1 = arith.constant 0 : i32
    %c0_i32_2 = arith.constant 0 : i32
    return %c0_i32, %c0_i32_0, %c0_i32_1 : i32, i32, i32
  }
  func.func @transform_4(%arg0: i32) -> (i32, i32) {
    %c0_i32 = arith.constant 0 : i32
    %c0_i32_0 = arith.constant 0 : i32
    %c0_i32_1 = arith.constant 0 : i32
    return %c0_i32, %c0_i32_0 : i32, i32
  }
  func.func @transform_5(%arg0: i32) -> (i32, i32) {
    %c0_i32 = arith.constant 0 : i32
    %c0_i32_0 = arith.constant 0 : i32
    %c0_i32_1 = arith.constant 0 : i32
    return %c0_i32, %c0_i32_0 : i32, i32
  }
  func.func @transform_6(%arg0: i32) -> (i32, i32, i32, i32) {
    %c0_i32 = arith.constant 0 : i32
    %c0_i32_0 = arith.constant 0 : i32
    %c0_i32_1 = arith.constant 0 : i32
    %c0_i32_2 = arith.constant 0 : i32
    return %arg0, %c0_i32, %c0_i32_0, %c0_i32_1 : i32, i32, i32, i32
  }
}

</mosaic_0001>

<bundles_post_ra>
// kernel: bottleneck_pallas.1
= control target key start
LH: loop header
LB: loop body
LE: loop exit
PB: predicated region body
PF: predicated region fallthrough
CT: control target
= control target key end

     0   :  { %s3455_s21 = smov 0   ;;  %s4697_s0 = inlined_call_operand.vmem [shape: f32[2,16,16,128], index: 0, kind: input, shape index: {}]   ;;  %s4698_s1 = inlined_call_operand.vmem [shape: bf16[128,128], index: 1, kind: input, shape index: {}]   ;;  %s4699_s2 = inlined_call_operand.vmem [shape: f32[1,128], index: 2, kind: input, shape index: {}]   ;;  %s4700_s3 = inlined_call_operand.vmem [shape: bf16[3,384,128], index: 3, kind: input, shape index: {}]   ;;  %s4701_s4 = inlined_call_operand.vmem [shape: f32[1,128], index: 4, kind: input, shape index: {}]   ;;  %s4702_s5 = inlined_call_operand.vmem [shape: bf16[128,128], index: 5, kind: input, shape index: {}]   ;;  %s4703_s6 = inlined_call_operand.vmem [shape: f32[2,16,16,128], index: 6, kind: output, shape index: {}]  }
   0x1 LB: > { %s2793_s22 = sadd.s32 4294967295, %s3416_s21   ;;  %p2797_p0 = scmp.ge.s32.totalorder %s3416_s21, 1  ;;  %s3416_s21 = sphi %s3455_s21, %s16_s21  }
   0x2   : > { %p212_p1 = scmp.lt.s32.totalorder %s3416_s21, 3 }
   0x4   : > { %p213_p2 = pnand %p2797_p0, %p212_p1 }
   0x6   : > { %216 = sbr.rel (%p213_p2) target bundleno = 1168 (0x490), region = 44 }
   0xb   : > { %v3261_v0 = vld [vmem:[%s4698_s1 + $0x38] sm:$0xff]  ;;  %v3260_v1 = vld [vmem:[%s4698_s1 + $0x30] sm:$0xff]  ;;  %v3259_v2 = vld [vmem:[%s4698_s1 + $0x28] sm:$0xff]  ;;  %p242_p3 = scmp.lt.s32.totalorder %s2793_s22, 1  ;;  %v3418_v51 = vmov 0.0  }
   0xc   : > { %368 = vmatpush.bf16.msra.mxu0 %v3261_v0  ;;  %3342 = vmatpush.bf16.msra.mxu3 %v3261_v0  ;;  %v3258_v3 = vld [vmem:[%s4698_s1 + $0x20] sm:$0xff]  ;;  %v3257_v4 = vld [vmem:[%s4698_s1 + $0x18] sm:$0xff]  ;;  %v3256_v5 = vld [vmem:[%s4698_s1 + $0x10] sm:$0xff]  ;;  %497 = vst [vmem:[#allocation2 + $0x18] sm:$0x1] %v3418_v51 }
   0xd   : > { %s4741_s22 = smov (!%p242_p3, %s2793_s22), 1  ;;  %v3255_v6 = vld [vmem:[%s4698_s1 + $0x8] sm:$0xff]  ;;  %v3254_v7 = vld [vmem:[%s4698_s1] sm:$0xff]  ;;  %v3520_v37 = vld [vmem:[%s4700_s3 + $0x138] sm:$0xff]  ;;  %489 = vst [vmem:[#allocation2] sm:$0xff] %v3418_v51 }
   0xe   : > { %s3252_s11 = sshll.u32 %s4741_s22, 8  ;;  %1179 = vmatpush.bf16.msra.mxu2 %v3520_v37  ;;  %v3526_v39 = vld [vmem:[%s4700_s3 + $0x130] sm:$0xff]  ;;  %v3293_v40 = vld [vmem:[%s4700_s3 + $0xf8] sm:$0xff]  ;;  %v3538_v42 = vld [vmem:[%s4700_s3 + $0x128] sm:$0xff]  ;;  %490 = vst [vmem:[#allocation2 + $0x8] sm:$0xff] %v3418_v51 }
   0xf   : > { %s3492_s16 = scalar_lea.vmem %s4697_s0, %s3252_s11  ;;  %1090 = vmatpush.bf16.msra.mxu1 %v3293_v40  ;;  %v3292_v41 = vld [vmem:[%s4700_s3 + $0xf0] sm:$0xff]  ;;  %v3544_v43 = vld [vmem:[%s4700_s3 + $0x120] sm:$0xff]  ;;  %v3291_v46 = vld [vmem:[%s4700_s3 + $0xe8] sm:$0xff]  ;;  %491 = vst [vmem:[#allocation2 + $0x10] sm:$0x3] %v3418_v51  ;;  %s4595_s27 = scalar_lea.vmem %s4703_s6, %s3252_s11 }
  0x10   : > { %369 = vmatpush.bf16.msra.mxu0 %v3260_v1  ;;  %3343 = vmatpush.bf16.msra.mxu3 %v3260_v1  ;;  %v252_v8 = vld [vmem:[%s3492_s16] sm:$0xff]  ;;  %v253_v9 = vld [vmem:[%s3492_s16 + $0x8] sm:$0xff]  ;;  %v254_v14 = vld [vmem:[%s3492_s16 + $0x10] sm:$0xff]  ;;  %493 = vst [vmem:[#allocation2 + $0x198] sm:$0xff] %v3418_v51 }
  0x11   : > { %v276_v10 = vld [vmem:[%s3492_s16 + $0xc0] sm:$0xff]  ;;  %v277_v11 = vld [vmem:[%s3492_s16 + $0xc8] sm:$0xff]  ;;  %v284_v12 = vpack.c.bf16 %v253_v9, %v252_v8  ;;  %v255_v15 = vld [vmem:[%s3492_s16 + $0x18] sm:$0xff]  ;;  %494 = vst [vmem:[#allocation2 + $0x1a0] sm:$0xff] %v3418_v51 }
  0x12   : > { %v296_v13 = vpack.c.bf16 %v277_v11, %v276_v10  ;;  %v278_v16 = vld [vmem:[%s3492_s16 + $0xd0] sm:$0xff]  ;;  %v279_v17 = vld [vmem:[%s3492_s16 + $0xd8] sm:$0xff]  ;;  %v285_v18 = vpack.c.bf16 %v255_v15, %v254_v14  ;;  %v256_v20 = vld [vmem:[%s3492_s16 + $0x20] sm:$0xff]  ;;  %1180 = vmatpush.bf16.msra.mxu2 %v3526_v39  ;;  %495 = vst [vmem:[#allocation2 + $0x1a8] sm:$0x3] %v3418_v51 }
  0x13   : > { %v297_v19 = vpack.c.bf16 %v279_v17, %v278_v16  ;;  %v257_v21 = vld [vmem:[%s3492_s16 + $0x28] sm:$0xff]  ;;  %v280_v22 = vld [vmem:[%s3492_s16 + $0xe0] sm:$0xff]  ;;  %v258_v26 = vld [vmem:[%s3492_s16 + $0x30] sm:$0xff]  ;;  %1091 = vmatpush.bf16.msra.mxu1 %v3292_v41  ;;  %498 = vst [vmem:[#allocation2 + $0x30] sm:$0x1] %v3418_v51 }
  0x14   : > { %370 = vmatpush.bf16.msra.mxu0 %v3259_v2  ;;  %3344 = vmatpush.bf16.msra.mxu3 %v3259_v2  ;;  %v281_v23 = vld [vmem:[%s3492_s16 + $0xe8] sm:$0xff]  ;;  %v286_v24 = vpack.c.bf16 %v257_v21, %v256_v20  ;;  %v259_v27 = vld [vmem:[%s3492_s16 + $0x38] sm:$0xff]  ;;  %v282_v28 = vld [vmem:[%s3492_s16 + $0xf0] sm:$0xff]  ;;  %499 = vst [vmem:[#allocation2 + $0x48] sm:$0x1] %v3418_v51 }
  0x15   : > { %v298_v25 = vpack.c.bf16 %v281_v23, %v280_v22  ;;  %v283_v29 = vld [vmem:[%s3492_s16 + $0xf8] sm:$0xff]  ;;  %v287_v30 = vpack.c.bf16 %v259_v27, %v258_v26  ;;  %v260_v32 = vld [vmem:[%s3492_s16 + $0x40] sm:$0xff]  ;;  %v261_v33 = vld [vmem:[%s3492_s16 + $0x48] sm:$0xff]  ;;  %500 = vst [vmem:[#allocation2 + $0x60] sm:$0x1] %v3418_v51 }
  0x16   : > { %v299_v31 = vpack.c.bf16 %v283_v29, %v282_v28  ;;  %v288_v34 = vpack.c.bf16 %v261_v33, %v260_v32  ;;  %v262_v35 = vld [vmem:[%s3492_s16 + $0x50] sm:$0xff]  ;;  %v263_v36 = vld [vmem:[%s3492_s16 + $0x58] sm:$0xff]  ;;  %1181 = vmatpush.bf16.msra.mxu2 %v3538_v42  ;;  %v264_v44 = vld [vmem:[%s3492_s16 + $0x60] sm:$0xff]  ;;  %501 = vst [vmem:[#allocation2 + $0x78] sm:$0x1] %v3418_v51 }
  0x17   : > { %v289_v38 = vpack.c.bf16 %v263_v36, %v262_v35  ;;  %v265_v45 = vld [vmem:[%s3492_s16 + $0x68] sm:$0xff]  ;;  %v3555_v47 = vld [vmem:[%s4700_s3 + $0x118] sm:$0xff]  ;;  %1092 = vmatpush.bf16.msra.mxu1 %v3291_v46  ;;  %v3290_v49 = vld [vmem:[%s4700_s3 + $0xe0] sm:$0xff]  ;;  %502 = vst [vmem:[#allocation2 + $0x90] sm:$0x1] %v3418_v51 }
  0x18   : > { %371 = vmatpush.bf16.msra.mxu0 %v3258_v3  ;;  %3345 = vmatpush.bf16.msra.mxu3 %v3258_v3  ;;  %v290_v48 = vpack.c.bf16 %v265_v45, %v264_v44  ;;  %v3564_v50 = vld [vmem:[%s4700_s3 + $0x110] sm:$0xff]  ;;  %v3289_v52 = vld [vmem:[%s4700_s3 + $0xd8] sm:$0xff]  ;;  %v3574_v53 = vld [vmem:[%s4700_s3 + $0x108] sm:$0xff]  ;;  %503 = vst [vmem:[#allocation2 + $0xa8] sm:$0x1] %v3418_v51 }
  0x19   : > { %v3288_v54 = vld [vmem:[%s4700_s3 + $0xd0] sm:$0xff]  ;;  %v3587_v55 = vld [vmem:[%s4700_s3 + $0x100] sm:$0xff]  ;;  %v267_v57 = vld [vmem:[%s3492_s16 + $0x78] sm:$0xff]  ;;  %504 = vst [vmem:[#allocation2 + $0xc0] sm:$0x1] %v3418_v51 }
  0x1a   : > { %1182 = vmatpush.bf16.msra.mxu2 %v3544_v43  ;;  %v266_v56 = vld [vmem:[%s3492_s16 + $0x70] sm:$0xff]  ;;  %v3287_v58 = vld [vmem:[%s4700_s3 + $0xc8] sm:$0xff]  ;;  %v3286_v60 = vld [vmem:[%s4700_s3 + $0xc0] sm:$0xff]  ;;  %505 = vst [vmem:[#allocation2 + $0xd8] sm:$0x1] %v3418_v51 }
  0x1b   : > { %1093 = vmatpush.bf16.msra.mxu1 %v3290_v49  ;;  %v291_v59 = vpack.c.bf16 %v267_v57, %v266_v56  ;;  %506 = vst [vmem:[#allocation2 + $0xf0] sm:$0x1] %v3418_v51  ;;  %v3269_v61 = vld [vmem:[%s4700_s3 + $0x38] sm:$0xff]  ;;  %v268_v63 = vld [vmem:[%s3492_s16 + $0x80] sm:$0xff]  ;;  %v269_v0 = vld [vmem:[%s3492_s16 + $0x88] sm:$0xff] }
  0x1c   : > { %372 = vmatpush.bf16.msra.mxu0 %v3257_v4  ;;  %3346 = vmatpush.bf16.msra.mxu3 %v3257_v4  ;;  %507 = vst [vmem:[#allocation2 + $0x108] sm:$0x1] %v3418_v51  ;;  %v3277_v62 = vld [vmem:[%s4700_s3 + $0x78] sm:$0xff]  ;;  %v3630_v1 = vld [vmem:[%s4699_s2] ss:$0 sm:$0xff]  ;;  %v292_v2 = vpack.c.bf16 %v269_v0, %v268_v63  ;;  %v270_v14 = vld [vmem:[%s3492_s16 + $0x90] sm:$0xff] }
  0x1d   : > { %508 = vst [vmem:[#allocation2 + $0x120] sm:$0x1] %v3418_v51  ;;  %v271_v15 = vld [vmem:[%s3492_s16 + $0x98] sm:$0xff]  ;;  %v3276_v26 = vld [vmem:[%s4700_s3 + $0x70] sm:$0xff] }
  0x1e   : > { %1183 = vmatpush.bf16.msra.mxu2 %v3555_v47  ;;  %509 = vst [vmem:[#allocation2 + $0x138] sm:$0x1] %v3418_v51  ;;  %v293_v20 = vpack.c.bf16 %v271_v15, %v270_v14 }
  0x1f   : > { %1094 = vmatpush.bf16.msra.mxu1 %v3289_v52  ;;  %510 = vst [vmem:[#allocation2 + $0x150] sm:$0x1] %v3418_v51 }
  0x20   : > { %373 = vmatpush.bf16.msra.mxu0 %v3256_v5  ;;  %3347 = vmatpush.bf16.msra.mxu3 %v3256_v5  ;;  %511 = vst [vmem:[#allocation2 + $0x168] sm:$0x1] %v3418_v51 }
  0x21   : > { %512 = vst [vmem:[#allocation2 + $0x180] sm:$0x1] %v3418_v51 }
  0x22   : > { %1184 = vmatpush.bf16.msra.mxu2 %v3564_v50  ;;  %513 = vst [vmem:[#allocation2 + $0x29] sm:$0x1] %v3418_v51 }
  0x23   : > { %1095 = vmatpush.bf16.msra.mxu1 %v3288_v54  ;;  %514 = vst [vmem:[#allocation2 + $0x41] sm:$0x1] %v3418_v51 }
  0x24   : > { %374 = vmatpush.bf16.msra.mxu0 %v3255_v6  ;;  %3348 = vmatpush.bf16.msra.mxu3 %v3255_v6  ;;  %515 = vst [vmem:[#allocation2 + $0x59] sm:$0x1] %v3418_v51 }
  0x25   : > { %516 = vst [vmem:[#allocation2 + $0x71] sm:$0x1] %v3418_v51 }
  0x26   : > { %1185 = vmatpush.bf16.msra.mxu2 %v3574_v53  ;;  %517 = vst [vmem:[#allocation2 + $0x89] sm:$0x1] %v3418_v51 }
  0x27   : > { %1096 = vmatpush.bf16.msra.mxu1 %v3287_v58  ;;  %518 = vst [vmem:[#allocation2 + $0xa1] sm:$0x1] %v3418_v51 }
  0x28   : > { %375 = vmatpush.bf16.msra.mxu0 %v3254_v7  ;;  %3349 = vmatpush.bf16.msra.mxu3 %v3254_v7  ;;  %519 = vst [vmem:[#allocation2 + $0xb9] sm:$0x1] %v3418_v51  ;;  %v3268_v7 = vld [vmem:[%s4700_s3 + $0x30] sm:$0xff] }
  0x29   : > { %520 = vst [vmem:[#allocation2 + $0xd1] sm:$0x1] %v3418_v51 }
  0x2a   : > { %1186 = vmatpush.bf16.msra.mxu2 %v3587_v55  ;;  %521 = vst [vmem:[#allocation2 + $0xe9] sm:$0x1] %v3418_v51 }
  0x2b   : > { %376 = vmatmul.bf16.vlgmr.msra.gmra.mxu0 %v284_v12  ;;  %436 = vmatmul.bf16.vlgmr.msra.gmra.mxu3 %v296_v13  ;;  %522 = vst [vmem:[#allocation2 + $0x101] sm:$0x1] %v3418_v51  ;;  %v3267_v12 = vld [vmem:[%s4700_s3 + $0x28] sm:$0xff] }
  0x2c   : > { %3350 = vmatpush.bf16.msrb.mxu3 %v3293_v40  ;;  %1097 = vmatpush.bf16.msra.mxu1 %v3286_v60  ;;  %523 = vst [vmem:[#allocation2 + $0x119] sm:$0x1] %v3418_v51 }
  0x2d   : > { %1501 = vmatpush.bf16.msrb.mxu0 %v3269_v61  ;;  %524 = vst [vmem:[#allocation2 + $0x131] sm:$0x1] %v3418_v51 }
  0x2e   : > { %525 = vst [vmem:[#allocation2 + $0x149] sm:$0x1] %v3418_v51 }
  0x2f   : > { %526 = vst [vmem:[#allocation2 + $0x161] sm:$0x1] %v3418_v51 }
  0x30   : > { %3351 = vmatpush.bf16.msrb.mxu3 %v3292_v41  ;;  %1590 = vmatpush.bf16.msrb.mxu1 %v3277_v62  ;;  %527 = vst [vmem:[#allocation2 + $0x179] sm:$0x1] %v3418_v51  ;;  %v272_v41 = vld [vmem:[%s3492_s16 + $0xa0] sm:$0xff] }
  0x31   : > { %1502 = vmatpush.bf16.msrb.mxu0 %v3268_v7  ;;  %528 = vst [vmem:[#allocation2 + $0x191] sm:$0x1] %v3418_v51 }
  0x34   : > { %3352 = vmatpush.bf16.msrb.mxu3 %v3291_v46  ;;  %1591 = vmatpush.bf16.msrb.mxu1 %v3276_v26  ;;  %v3262_v46 = vld [vmem:[%s4700_s3] sm:$0xff] }
  0x35   : > { %1503 = vmatpush.bf16.msrb.mxu0 %v3267_v12 }
  0x38   : > { %3353 = vmatpush.bf16.msrb.mxu3 %v3290_v49 }
  0x3b   : > { %381 = vmatmul.bf16.gmra.mxu0 %v285_v18  ;;  %441 = vmatmul.bf16.gmra.mxu3 %v297_v19  ;;  %v3266_v18 = vld [vmem:[%s4700_s3 + $0x20] sm:$0xff] }
  0x3c   : > { %3354 = vmatpush.bf16.msrb.mxu3 %v3289_v52  ;;  %1504 = vmatpush.bf16.msrb.mxu0 %v3266_v18 }
  0x40   : > { %3355 = vmatpush.bf16.msrb.mxu3 %v3288_v54 }
  0x44   : > { %3356 = vmatpush.bf16.msrb.mxu3 %v3287_v58  ;;  %v3275_v58 = vld [vmem:[%s4700_s3 + $0x68] sm:$0xff] }
  0x45   : > { %1592 = vmatpush.bf16.msrb.mxu1 %v3275_v58 }
  0x48   : > { %3357 = vmatpush.bf16.msrb.mxu3 %v3286_v60 }
  0x4b   : > { %386 = vmatmul.bf16.gmra.mxu0 %v286_v24  ;;  %446 = vmatmul.bf16.gmra.mxu3 %v298_v25  ;;  %v3265_v24 = vld [vmem:[%s4700_s3 + $0x18] sm:$0xff] }
  0x4c   : > { %3358 = vmatpush.bf16.msra.mxu3 %v3520_v37  ;;  %1505 = vmatpush.bf16.msrb.mxu0 %v3265_v24 }
  0x50   : > { %3359 = vmatpush.bf16.msra.mxu3 %v3526_v39 }
  0x54   : > { %3360 = vmatpush.bf16.msra.mxu3 %v3538_v42  ;;  %v273_v42 = vld [vmem:[%s3492_s16 + $0xa8] sm:$0xff] }
  0x58   : > { %3361 = vmatpush.bf16.msra.mxu3 %v3544_v43 }
  0x5b   : > { %391 = vmatmul.bf16.gmra.mxu0 %v287_v30  ;;  %451 = vmatmul.bf16.gmra.mxu3 %v299_v31  ;;  %v3264_v31 = vld [vmem:[%s4700_s3 + $0x10] sm:$0xff] }
  0x5c   : > { %3362 = vmatpush.bf16.msra.mxu3 %v3555_v47  ;;  %1506 = vmatpush.bf16.msrb.mxu0 %v3264_v31 }
  0x60   : > { %3363 = vmatpush.bf16.msra.mxu3 %v3564_v50 }
  0x64   : > { %3364 = vmatpush.bf16.msra.mxu3 %v3574_v53 }
  0x68   : > { %3365 = vmatpush.bf16.msra.mxu3 %v3587_v55 }
  0x6b   : > { %396 = vmatmul.bf16.gmra.mxu0 %v288_v34 }
  0x7b   : > { %401 = vmatmul.bf16.gmra.mxu0 %v289_v38  ;;  %v3263_v38 = vld [vmem:[%s4700_s3 + $0x8] sm:$0xff] }
  0x7c   : > { %1507 = vmatpush.bf16.msrb.mxu0 %v3263_v38 }
  0x80   : > { %1508 = vmatpush.bf16.msrb.mxu0 %v3262_v46 }
  0x8b   : > { %406 = vmatmul.bf16.gmra.mxu0 %v290_v48  ;;  %v294_v48 = vpack.c.bf16 %v273_v42, %v272_v41 }
  0x9b   : > { %411 = vmatmul.bf16.gmra.mxu0 %v291_v59 }
  0xa8   : > { %v377_v3 = vpop.f32.mrf.mxu0 }
  0xa9   : > { %v378_v4 = vadd.f32 %v3630_v1, %v377_v3  ;;  %v274_v3 = vld [vmem:[%s3492_s16 + $0xb0] sm:$0xff] }
  0xab   : > { %v457_v5 = vmax.f32 %v378_v4, 0.0  ;;  %416 = vmatmul.bf16.gmra.mxu0 %v292_v2  ;;  %v275_v4 = vld [vmem:[%s3492_s16 + $0xb8] sm:$0xff] }
  0xad   : > { %529 = vst [vmem:[#allocation2 + $0x19] sm:$0xff] %v457_v5 }
  0xae   : > { %v437_v6 = vpop.f32.mrf.mxu3 }
  0xaf   : > { %v438_v8 = vadd.f32 %v3630_v1, %v437_v6 }
  0xb0   : > { %v379_v9 = vpop.f32.mrf.mxu0 }
  0xb1   : > { %v481_v10 = vmax.f32 %v438_v8, 0.0  ;;  %v380_v11 = vadd.f32 %v3630_v1, %v379_v9  ;;  %v295_v9 = vpack.c.bf16 %v275_v4, %v274_v3 }
  0xb3   : > { %553 = vst [vmem:[#allocation2 + $0x139] sm:$0xff] %v481_v10  ;;  %v458_v13 = vmax.f32 %v380_v11, 0.0 }
  0xb4   : > { %v753_v27 = vld [vmem:[#allocation2 + $0x18] sm:$0xff] }
  0xb5   : > { %530 = vst [vmem:[#allocation2 + $0x21] sm:$0xff] %v458_v13  ;;  %v850_v16 = vpack.c.bf16 %v458_v13, %v457_v5 }
  0xb6   : > { %v439_v17 = vpop.f32.mrf.mxu3 }
  0xb7   : > { %v440_v19 = vadd.f32 %v3630_v1, %v439_v17  ;;  %1187 = vmatmul.bf16.vlgmr.msra.gmra.mxu2 %v850_v16 }
  0xb8   : > { %v382_v21 = vpop.f32.mrf.mxu0 }
  0xb9   : > { %v482_v22 = vmax.f32 %v440_v19, 0.0  ;;  %v383_v23 = vadd.f32 %v3630_v1, %v382_v21 }
  0xba   : > { %v777_v34 = vld [vmem:[#allocation2 + $0x138] sm:$0xff] }
  0xbb   : > { %554 = vst [vmem:[#allocation2 + $0x141] sm:$0xff] %v482_v22  ;;  %v459_v25 = vmax.f32 %v383_v23, 0.0  ;;  %421 = vmatmul.bf16.gmra.mxu0 %v293_v20  ;;  %v3687_v44 = vpack.c.bf16 %v482_v22, %v481_v10 }
  0xbc   : > { %v754_v28 = vld [vmem:[#allocation2 + $0x20] sm:$0xff] }
  0xbd   : > { %531 = vst [vmem:[#allocation2 + $0x31] sm:$0xff] %v459_v25  ;;  %v3674_v29 = vpack.c.bf16 %v754_v28, %v753_v27  ;;  %v3274_v27 = vld [vmem:[%s4700_s3 + $0x60] sm:$0xff] }
  0xbe   : > { %v442_v30 = vpop.f32.mrf.mxu3  ;;  %1593 = vmatpush.bf16.msrb.mxu1 %v3274_v27 }
  0xbf   : > { %v443_v32 = vadd.f32 %v3630_v1, %v442_v30  ;;  %1098 = vmatmul.bf16.vlgmr.msra.gmra.mxu1 %v3674_v29 }
  0xc0   : > { %v384_v33 = vpop.f32.mrf.mxu0 }
  0xc1   : > { %v483_v35 = vmax.f32 %v443_v32, 0.0  ;;  %v385_v36 = vadd.f32 %v3630_v1, %v384_v33 }
  0xc2   : > { %v778_v37 = vld [vmem:[#allocation2 + $0x140] sm:$0xff] }
  0xc3   : > { %555 = vst [vmem:[#allocation2 + $0x151] sm:$0xff] %v483_v35  ;;  %v460_v39 = vmax.f32 %v385_v36, 0.0  ;;  %v885_v40 = vpack.c.bf16 %v778_v37, %v777_v34  ;;  %v3419_v36 = vmov 0.0|0.0  }
  0xc4   : > { %v755_v53 = vld [vmem:[#allocation2 + $0x30] sm:$0xff] }
  0xc5   : > { %532 = vst [vmem:[#allocation2 + $0x39] sm:$0xff] %v460_v39  ;;  %1158 = vmatmul.bf16.vlgmr.msrb.gmra.mxu3 %v885_v40  ;;  %v853_v43 = vpack.c.bf16 %v460_v39, %v459_v25 }
  0xc6   : > { %v444_v45 = vpop.f32.mrf.mxu3 }
  0xc7   : > { %v445_v47 = vadd.f32 %v3630_v1, %v444_v45  ;;  %1192 = vmatmul.bf16.gmra.mxu2 %v853_v43 }
  0xc8   : > { %v387_v49 = vpop.f32.mrf.mxu0 }
  0xc9   : > { %v484_v50 = vmax.f32 %v445_v47, 0.0  ;;  %v388_v51 = vadd.f32 %v3630_v1, %v387_v49 }
  0xca   : > { %v779_v60 = vld [vmem:[#allocation2 + $0x150] sm:$0xff] }
  0xcb   : > { %556 = vst [vmem:[#allocation2 + $0x159] sm:$0xff] %v484_v50  ;;  %v461_v52 = vmax.f32 %v388_v51, 0.0  ;;  %426 = vmatmul.bf16.gmra.mxu0 %v294_v48  ;;  %v3704_v6 = vpack.c.bf16 %v484_v50, %v483_v35 }
  0xcc   : > { %v756_v54 = vld [vmem:[#allocation2 + $0x38] sm:$0xff] }
  0xcd   : > { %533 = vst [vmem:[#allocation2 + $0x49] sm:$0xff] %v461_v52  ;;  %v3694_v55 = vpack.c.bf16 %v756_v54, %v755_v53 }
  0xce   : > { %v447_v56 = vpop.f32.mrf.mxu3 }
  0xcf   : > { %v448_v57 = vadd.f32 %v3630_v1, %v447_v56  ;;  %1103 = vmatmul.bf16.gmra.mxu1 %v3694_v55  ;;  %v3273_v56 = vld [vmem:[%s4700_s3 + $0x58] sm:$0xff] }
  0xd0   : > { %v389_v59 = vpop.f32.mrf.mxu0  ;;  %1594 = vmatpush.bf16.msrb.mxu1 %v3273_v56 }
  0xd1   : > { %v485_v61 = vmax.f32 %v448_v57, 0.0  ;;  %v390_v62 = vadd.f32 %v3630_v1, %v389_v59 }
  0xd2   : > { %v780_v63 = vld [vmem:[#allocation2 + $0x158] sm:$0xff] }
  0xd3   : > { %557 = vst [vmem:[#allocation2 + $0x169] sm:$0xff] %v485_v61  ;;  %v462_v0 = vmax.f32 %v390_v62, 0.0  ;;  %v888_v2 = vpack.c.bf16 %v780_v63, %v779_v60  ;;  %v3308_v62 = vld [vmem:[%s4700_s3 + $0x170] sm:$0xff] }
  0xd4   : > { %v757_v14 = vld [vmem:[#allocation2 + $0x48] sm:$0xff] }
  0xd5   : > { %534 = vst [vmem:[#allocation2 + $0x51] sm:$0xff] %v462_v0  ;;  %1163 = vmatmul.bf16.gmra.mxu3 %v888_v2  ;;  %v856_v5 = vpack.c.bf16 %v462_v0, %v461_v52 }
  0xd6   : > { %v449_v7 = vpop.f32.mrf.mxu3 }
  0xd7   : > { %v450_v8 = vadd.f32 %v3630_v1, %v449_v7  ;;  %1197 = vmatmul.bf16.gmra.mxu2 %v856_v5  ;;  %v3306_v7 = vld [vmem:[%s4700_s3 + $0x160] sm:$0xff] }
  0xd8   : > { %v392_v10 = vpop.f32.mrf.mxu0 }
  0xd9   : > { %v486_v11 = vmax.f32 %v450_v8, 0.0  ;;  %v393_v12 = vadd.f32 %v3630_v1, %v392_v10 }
  0xda   : > { %v781_v20 = vld [vmem:[#allocation2 + $0x168] sm:$0xff] }
  0xdb   : > { %558 = vst [vmem:[#allocation2 + $0x171] sm:$0xff] %v486_v11  ;;  %v463_v13 = vmax.f32 %v393_v12, 0.0  ;;  %431 = vmatmul.bf16.gmra.mxu0 %v295_v9  ;;  %v3720_v28 = vpack.c.bf16 %v486_v11, %v485_v61  ;;  %v3305_v9 = vld [vmem:[%s4700_s3 + $0x158] sm:$0xff]  ;;  %v3272_v11 = vld [vmem:[%s4700_s3 + $0x50] sm:$0xff] }
  0xdc   : > { %v758_v15 = vld [vmem:[#allocation2 + $0x50] sm:$0xff]  ;;  %1595 = vmatpush.bf16.msrb.mxu1 %v3272_v11 }
  0xdd   : > { %535 = vst [vmem:[#allocation2 + $0x61] sm:$0xff] %v463_v13  ;;  %v3708_v16 = vpack.c.bf16 %v758_v15, %v757_v14 }
  0xde   : > { %v452_v17 = vpop.f32.mrf.mxu3 }
  0xdf   : > { %v453_v18 = vadd.f32 %v3630_v1, %v452_v17  ;;  %1108 = vmatmul.bf16.gmra.mxu1 %v3708_v16 }
  0xe0   : > { %v394_v19 = vpop.f32.mrf.mxu0 }
  0xe1   : > { %v487_v21 = vmax.f32 %v453_v18, 0.0  ;;  %v395_v22 = vadd.f32 %v3630_v1, %v394_v19  ;;  %v3303_v18 = vld [vmem:[%s4700_s3 + $0x148] sm:$0xff] }
  0xe2   : > { %v782_v23 = vld [vmem:[#allocation2 + $0x170] sm:$0xff] }
  0xe3   : > { %559 = vst [vmem:[#allocation2 + $0x181] sm:$0xff] %v487_v21  ;;  %v3713_v24 = vmax.f32 %v395_v22, 0.0  ;;  %v891_v25 = vpack.c.bf16 %v782_v23, %v781_v20 }
  0xe4   : > { %v759_v37 = vld [vmem:[#allocation2 + $0x60] sm:$0xff] }
  0xe5   : > { %536 = vst [vmem:[#allocation2 + $0x69] sm:$0xff] %v3713_v24  ;;  %1168 = vmatmul.bf16.gmra.mxu3 %v891_v25  ;;  %v859_v26 = vpack.c.bf16 %v3713_v24, %v463_v13  ;;  %v3304_v13 = vld [vmem:[%s4700_s3 + $0x150] sm:$0xff] }
  0xe6   : > { %v454_v30 = vpop.f32.mrf.mxu3 }
  0xe7   : > { %v455_v31 = vadd.f32 %v3630_v1, %v454_v30  ;;  %1202 = vmatmul.bf16.gmra.mxu2 %v859_v26 }
  0xe8   : > { %v397_v32 = vpop.f32.mrf.mxu0 }
  0xe9   : > { %v488_v33 = vmax.f32 %v455_v31, 0.0  ;;  %v398_v34 = vadd.f32 %v3630_v1, %v397_v32 }
  0xea   : > { %v783_v41 = vld [vmem:[#allocation2 + $0x180] sm:$0xff] }
  0xeb   : > { %560 = vst [vmem:[#allocation2 + $0x189] sm:$0xff] %v488_v33  ;;  %v465_v35 = vmax.f32 %v398_v34, 0.0  ;;  %1509 = vmatmul.bf16.vlgmr.msrb.gmra.mxu0 %v3419_v36  ;;  %v3732_v48 = vpack.c.bf16 %v488_v33, %v487_v21  ;;  %v3302_v21 = vld [vmem:[%s4700_s3 + $0x140] sm:$0xff]  ;;  %v3271_v33 = vld [vmem:[%s4700_s3 + $0x48] sm:$0xff] }
  0xec   : > { %v760_v38 = vld [vmem:[#allocation2 + $0x68] sm:$0xff]  ;;  %1596 = vmatpush.bf16.msrb.mxu1 %v3271_v33 }
  0xed   : > { %537 = vst [vmem:[#allocation2 + $0x79] sm:$0xff] %v465_v35  ;;  %v3724_v39 = vpack.c.bf16 %v760_v38, %v759_v37 }
  0xef   : > { %1113 = vmatmul.bf16.gmra.mxu1 %v3724_v39 }
  0xf0   : > { %v399_v40 = vpop.f32.mrf.mxu0 }
  0xf1   : > { %v400_v42 = vadd.f32 %v3630_v1, %v399_v40 }
  0xf2   : > { %v784_v43 = vld [vmem:[#allocation2 + $0x188] sm:$0xff] }
  0xf3   : > { %v3728_v45 = vmax.f32 %v400_v42, 0.0  ;;  %v894_v46 = vpack.c.bf16 %v784_v43, %v783_v41  ;;  %v3284_v41 = vld [vmem:[%s4700_s3 + $0xb0] sm:$0xff] }
  0xf4   : > { %v761_v52 = vld [vmem:[#allocation2 + $0x78] sm:$0xff] }
  0xf5   : > { %538 = vst [vmem:[#allocation2 + $0x81] sm:$0xff] %v3728_v45  ;;  %1173 = vmatmul.bf16.gmra.mxu3 %v894_v46  ;;  %v862_v47 = vpack.c.bf16 %v3728_v45, %v465_v35 }
  0xf7   : > { %1207 = vmatmul.bf16.gmra.mxu2 %v862_v47 }
  0xf8   : > { %v402_v49 = vpop.f32.mrf.mxu0 }
  0xf9   : > { %v403_v50 = vadd.f32 %v3630_v1, %v402_v49 }
  0xfb   : > { %v467_v51 = vmax.f32 %v403_v50, 0.0  ;;  %1514 = vmatmul.bf16.gmra.mxu0 %v3674_v29  ;;  %v3309_v29 = vld [vmem:[%s4700_s3 + $0x178] sm:$0xff]  ;;  %v3283_v50 = vld [vmem:[%s4700_s3 + $0xa8] sm:$0xff] }
  0xfc   : > { %v762_v53 = vld [vmem:[#allocation2 + $0x80] sm:$0xff]  ;;  %1268 = vmatpush.bf16.msrb.mxu3 %v3309_v29 }
  0xfd   : > { %539 = vst [vmem:[#allocation2 + $0x91] sm:$0xff] %v467_v51  ;;  %v3736_v54 = vpack.c.bf16 %v762_v53, %v761_v52  ;;  %v817_v52 = vld [vmem:[#allocation2 + $0x1a] sm:$0xff]  ;;  %v818_v53 = vld [vmem:[#allocation2 + $0x22] sm:$0xff] }
  0xfe   : > { %v3819_v29 = vpack.c.bf16 %v818_v53, %v817_v52 }
  0xff   : > { %1118 = vmatmul.bf16.gmra.mxu1 %v3736_v54 }
 0x100   : > { %v404_v57 = vpop.f32.mrf.mxu0  ;;  %1269 = vmatpush.bf16.msrb.mxu3 %v3308_v62 }
 0x101   : > { %v405_v58 = vadd.f32 %v3630_v1, %v404_v57  ;;  %v3282_v57 = vld [vmem:[%s4700_s3 + $0xa0] sm:$0xff] }
 0x103   : > { %v3743_v59 = vmax.f32 %v405_v58, 0.0 }
 0x104   : > { %v763_v2 = vld [vmem:[#allocation2 + $0x90] sm:$0xff] }
 0x105   : > { %540 = vst [vmem:[#allocation2 + $0x99] sm:$0xff] %v3743_v59  ;;  %1247 = vmatmul.bf16.vlgmr.msra.gmra.mxu3 %v3687_v44  ;;  %v865_v60 = vpack.c.bf16 %v3743_v59, %v467_v51  ;;  %v3307_v44 = vld [vmem:[%s4700_s3 + $0x168] sm:$0xff] }
 0x106   : > { %1270 = vmatpush.bf16.msrb.mxu3 %v3307_v44 }
 0x107   : > { %1212 = vmatmul.bf16.gmra.mxu2 %v865_v60 }
 0x108   : > { %v407_v61 = vpop.f32.mrf.mxu0 }
 0x109   : > { %v408_v63 = vadd.f32 %v3630_v1, %v407_v61 }
 0x10a   : > { %1271 = vmatpush.bf16.msrb.mxu3 %v3306_v7  ;;  %v3280_v7 = vld [vmem:[%s4700_s3 + $0x90] sm:$0xff] }
 0x10b   : > { %v469_v0 = vmax.f32 %v408_v63, 0.0  ;;  %1519 = vmatmul.bf16.gmra.mxu0 %v3694_v55  ;;  %v3270_v63 = vld [vmem:[%s4700_s3 + $0x40] sm:$0xff] }
 0x10c   : > { %v764_v3 = vld [vmem:[#allocation2 + $0x98] sm:$0xff]  ;;  %1597 = vmatpush.bf16.msrb.mxu1 %v3270_v63 }
 0x10d   : > { %541 = vst [vmem:[#allocation2 + $0xa9] sm:$0xff] %v469_v0  ;;  %v3759_v4 = vpack.c.bf16 %v764_v3, %v763_v2 }
 0x10e   : > { %1272 = vmatpush.bf16.msrb.mxu3 %v3305_v9 }
 0x10f   : > { %1123 = vmatmul.bf16.gmra.mxu1 %v3759_v4 }
 0x110   : > { %v409_v5 = vpop.f32.mrf.mxu0 }
 0x111   : > { %v410_v8 = vadd.f32 %v3630_v1, %v409_v5 }
 0x112   : > { %1273 = vmatpush.bf16.msrb.mxu3 %v3304_v13  ;;  %v3279_v13 = vld [vmem:[%s4700_s3 + $0x88] sm:$0xff] }
 0x113   : > { %v470_v55 = vmax.f32 %v410_v8, 0.0 }
 0x115   : > { %542 = vst [vmem:[#allocation2 + $0xb1] sm:$0xff] %v470_v55  ;;  %1252 = vmatmul.bf16.gmra.mxu3 %v3704_v6  ;;  %v868_v10 = vpack.c.bf16 %v470_v55, %v469_v0  ;;  %v765_v6 = vld [vmem:[#allocation2 + $0xa8] sm:$0xff]  ;;  %v3281_v0 = vld [vmem:[%s4700_s3 + $0x98] sm:$0xff] }
 0x116   : > { %1274 = vmatpush.bf16.msrb.mxu3 %v3303_v18 }
 0x117   : > { %1217 = vmatmul.bf16.gmra.mxu2 %v868_v10 }
 0x118   : > { %v412_v12 = vpop.f32.mrf.mxu0 }
 0x119   : > { %v413_v14 = vadd.f32 %v3630_v1, %v412_v12 }
 0x11a   : > { %1275 = vmatpush.bf16.msrb.mxu3 %v3302_v21 }
 0x11b   : > { %v471_v15 = vmax.f32 %v413_v14, 0.0  ;;  %1524 = vmatmul.bf16.gmra.mxu0 %v3708_v16 }
 0x11c   : > { %v766_v17 = vld [vmem:[#allocation2 + $0xb0] sm:$0xff] }
 0x11d   : > { %543 = vst [vmem:[#allocation2 + $0xc1] sm:$0xff] %v471_v15  ;;  %v3781_v19 = vpack.c.bf16 %v766_v17, %v765_v6  ;;  %v819_v6 = vld [vmem:[#allocation2 + $0x32] sm:$0xff] }
 0x11f   : > { %1128 = vmatmul.bf16.gmra.mxu1 %v3781_v19 }
 0x120   : > { %v414_v20 = vpop.f32.mrf.mxu0 }
 0x121   : > { %v415_v22 = vadd.f32 %v3630_v1, %v414_v20  ;;  %v3278_v20 = vld [vmem:[%s4700_s3 + $0x80] sm:$0xff] }
 0x123   : > { %v472_v16 = vmax.f32 %v415_v22, 0.0 }
 0x124   : > { %v767_v30 = vld [vmem:[#allocation2 + $0xc0] sm:$0xff] }
 0x125   : > { %544 = vst [vmem:[#allocation2 + $0xc9] sm:$0xff] %v472_v16  ;;  %1257 = vmatmul.bf16.gmra.mxu3 %v3720_v28  ;;  %v871_v23 = vpack.c.bf16 %v472_v16, %v471_v15  ;;  %v3285_v28 = vld [vmem:[%s4700_s3 + $0xb8] sm:$0xff] }
 0x126   : > { %1679 = vmatpush.bf16.msrb.mxu2 %v3285_v28 }
 0x127   : > { %1222 = vmatmul.bf16.gmra.mxu2 %v871_v23 }
 0x128   : > { %v417_v25 = vpop.f32.mrf.mxu0 }
 0x129   : > { %v418_v26 = vadd.f32 %v3630_v1, %v417_v25 }
 0x12a   : > { %1680 = vmatpush.bf16.msrb.mxu2 %v3284_v41 }
 0x12b   : > { %v473_v27 = vmax.f32 %v418_v26, 0.0  ;;  %1529 = vmatmul.bf16.gmra.mxu0 %v3724_v39  ;;  %v3317_v26 = vld [vmem:[%s4700_s3 + $0x1b8] sm:$0xff] }
 0x12c   : > { %v768_v31 = vld [vmem:[#allocation2 + $0xc8] sm:$0xff]  ;;  %2106 = vmatpush.bf16.msra.mxu3 %v3317_v26  ;;  %v3324_v26 = vld [vmem:[%s4700_s3 + $0x1f0] sm:$0xff] }
 0x12d   : > { %545 = vst [vmem:[#allocation2 + $0xd9] sm:$0xff] %v473_v27  ;;  %v3791_v32 = vpack.c.bf16 %v768_v31, %v767_v30 }
 0x12e   : > { %1681 = vmatpush.bf16.msrb.mxu2 %v3283_v50 }
 0x12f   : > { %1133 = vmatmul.bf16.gmra.mxu1 %v3791_v32 }
 0x130   : > { %v419_v34 = vpop.f32.mrf.mxu0 }
 0x131   : > { %v420_v35 = vadd.f32 %v3630_v1, %v419_v34 }
 0x132   : > { %1682 = vmatpush.bf16.msrb.mxu2 %v3282_v57 }
 0x133   : > { %v474_v36 = vmax.f32 %v420_v35, 0.0 }
 0x134   : > { %v769_v46 = vld [vmem:[#allocation2 + $0xd8] sm:$0xff] }
 0x135   : > { %546 = vst [vmem:[#allocation2 + $0xe1] sm:$0xff] %v474_v36  ;;  %1262 = vmatmul.bf16.gmra.mxu3 %v3732_v48  ;;  %v874_v37 = vpack.c.bf16 %v474_v36, %v473_v27 }
 0x136   : > { %1683 = vmatpush.bf16.msrb.mxu2 %v3281_v0 }
 0x137   : > { %1227 = vmatmul.bf16.gmra.mxu2 %v874_v37  ;;  %v3325_v37 = vld [vmem:[%s4700_s3 + $0x1f8] sm:$0xff] }
 0x138   : > { %v422_v38 = vpop.f32.mrf.mxu0  ;;  %2195 = vmatpush.bf16.msra.mxu0 %v3325_v37 }
 0x139   : > { %v423_v39 = vadd.f32 %v3630_v1, %v422_v38 }
 0x13a   : > { %v1188_v40 = vpop.f32.mrf.mxu2  ;;  %1684 = vmatpush.bf16.msrb.mxu2 %v3280_v7  ;;  %v824_v7 = vld [vmem:[#allocation2 + $0x6a] sm:$0xff] }
 0x13b   : > { %v475_v42 = vmax.f32 %v423_v39, 0.0  ;;  %1534 = vmatmul.bf16.gmra.mxu0 %v3736_v54 }
 0x13c   : > { %v1099_v43 = vpop.f32.mrf.mxu1  ;;  %v770_v47 = vld [vmem:[#allocation2 + $0xe0] sm:$0xff]  ;;  %2196 = vmatpush.bf16.msra.mxu0 %v3324_v26 }
 0x13d   : > { %547 = vst [vmem:[#allocation2 + $0xf1] sm:$0xff] %v475_v42  ;;  %v3807_v49 = vpack.c.bf16 %v770_v47, %v769_v46  ;;  %v3809_v48 = vadd.f32 %v1188_v40, %v1099_v43  ;;  %v3333_v40 = vld [vmem:[%s4700_s3 + $0x238] sm:$0xff] }
 0x13e   : > { %1685 = vmatpush.bf16.msrb.mxu2 %v3279_v13  ;;  %v822_v43 = vld [vmem:[#allocation2 + $0x52] sm:$0xff]  ;;  %2284 = vmatpush.bf16.msra.mxu1 %v3333_v40 }
 0x13f   : > { %1138 = vmatmul.bf16.gmra.mxu1 %v3807_v49 }
 0x140   : > { %v424_v51 = vpop.f32.mrf.mxu0 }
 0x141   : > { %v425_v54 = vadd.f32 %v3630_v1, %v424_v51 }
 0x142   : > { %v1190_v56 = vpop.f32.mrf.mxu2  ;;  %1686 = vmatpush.bf16.msrb.mxu2 %v3278_v20  ;;  %v594_v20 = vld [vmem:[#allocation2 + $0x9] sm:$0xff] }
 0x143   : > { %v476_v58 = vmax.f32 %v425_v54, 0.0 }
 0x144   : > { %v1101_v60 = vpop.f32.mrf.mxu1  ;;  %v771_v9 = vld [vmem:[#allocation2 + $0xf0] sm:$0xff] }
 0x145   : > { %548 = vst [vmem:[#allocation2 + $0xf9] sm:$0xff] %v476_v58  ;;  %1276 = vmatmul.bf16.vlgmr.msrb.gmra.mxu3 %v3819_v29  ;;  %v3822_v61 = vadd.f32 %v1190_v56, %v1101_v60  ;;  %v877_v62 = vpack.c.bf16 %v476_v58, %v475_v42  ;;  %v821_v42 = vld [vmem:[#allocation2 + $0x4a] sm:$0xff] }
 0x146   : > { %v3877_v51 = vpack.c.bf16 %v822_v43, %v821_v42 }
 0x147   : > { %1232 = vmatmul.bf16.gmra.mxu2 %v877_v62 }
 0x148   : > { %v427_v2 = vpop.f32.mrf.mxu0  ;;  %v3830_v3 = vpop.f32.mrf.mxu3 }
 0x149   : > { %v428_v44 = vadd.f32 %v3630_v1, %v427_v2  ;;  %v823_v2 = vld [vmem:[#allocation2 + $0x62] sm:$0xff] }
 0x14a   : > { %v1193_v5 = vpop.f32.mrf.mxu2 }
 0x14b   : > { %v477_v8 = vmax.f32 %v428_v44, 0.0  ;;  %1539 = vmatmul.bf16.gmra.mxu0 %v3759_v4  ;;  %v820_v4 = vld [vmem:[#allocation2 + $0x3a] sm:$0xff] }
 0x14c   : > { %v1104_v55 = vpop.f32.mrf.mxu1  ;;  %v772_v10 = vld [vmem:[#allocation2 + $0xf8] sm:$0xff]  ;;  %v3851_v22 = vpack.c.bf16 %v820_v4, %v819_v6  ;;  %v3316_v6 = vld [vmem:[%s4700_s3 + $0x1b0] sm:$0xff] }
 0x14d   : > { %549 = vst [vmem:[#allocation2 + $0x109] sm:$0xff] %v477_v8  ;;  %v3837_v11 = vpack.c.bf16 %v772_v10, %v771_v9  ;;  %v3839_v12 = vadd.f32 %v1193_v5, %v1104_v55  ;;  %v626_v55 = vld [vmem:[#allocation2 + $0xa] sm:$0xff]  ;;  %v3896_v10 = vpack.c.bf16 %v824_v7, %v823_v2  ;;  %2107 = vmatpush.bf16.msra.mxu3 %v3316_v6 }
 0x14f   : > { %1143 = vmatmul.bf16.gmra.mxu1 %v3837_v11 }
 0x150   : > { %v429_v14 = vpop.f32.mrf.mxu0  ;;  %v3845_v15 = vpop.f32.mrf.mxu3 }
 0x151   : > { %v430_v17 = vadd.f32 %v3630_v1, %v429_v14 }
 0x152   : > { %v1195_v18 = vpop.f32.mrf.mxu2 }
 0x153   : > { %v478_v21 = vmax.f32 %v430_v17, 0.0 }
 0x154   : > { %v1106_v16 = vpop.f32.mrf.mxu1  ;;  %v773_v35 = vld [vmem:[#allocation2 + $0x108] sm:$0xff] }
 0x155   : > { %550 = vst [vmem:[#allocation2 + $0x111] sm:$0xff] %v478_v21  ;;  %1281 = vmatmul.bf16.gmra.mxu3 %v3851_v22  ;;  %v3854_v23 = vadd.f32 %v1195_v18, %v1106_v16  ;;  %v880_v25 = vpack.c.bf16 %v478_v21, %v477_v8  ;;  %v625_v8 = vld [vmem:[#allocation2 + $0x2] sm:$0xff] }
 0x156   : > { %v593_v18 = vld [vmem:[#allocation2 + $0x1] sm:$0xff] }
 0x157   : > { %1237 = vmatmul.bf16.gmra.mxu2 %v880_v25  ;;  %v658_v16 = vpack.c.bf16 %v594_v20, %v593_v18  ;;  %v597_v20 = vld [vmem:[#allocation2 + $0x31] sm:$0xff] }
 0x158   : > { %v432_v27 = vpop.f32.mrf.mxu0  ;;  %v3859_v30 = vpop.f32.mrf.mxu3 }
 0x159   : > { %v433_v31 = vadd.f32 %v3630_v1, %v432_v27 }
 0x15a   : > { %v1198_v33 = vpop.f32.mrf.mxu2 }
 0x15b   : > { %v479_v28 = vmax.f32 %v433_v31, 0.0  ;;  %1544 = vmatmul.bf16.gmra.mxu0 %v3781_v19  ;;  %v3332_v31 = vld [vmem:[%s4700_s3 + $0x230] sm:$0xff] }
 0x15c   : > { %v1109_v34 = vpop.f32.mrf.mxu1  ;;  %v774_v36 = vld [vmem:[#allocation2 + $0x110] sm:$0xff]  ;;  %2285 = vmatpush.bf16.msra.mxu1 %v3332_v31 }
 0x15d   : > { %551 = vst [vmem:[#allocation2 + $0x121] sm:$0xff] %v479_v28  ;;  %v3866_v38 = vpack.c.bf16 %v774_v36, %v773_v35  ;;  %v3868_v39 = vadd.f32 %v1198_v33, %v1109_v34  ;;  %v825_v34 = vld [vmem:[#allocation2 + $0x7a] sm:$0xff]  ;;  %v830_v31 = vld [vmem:[#allocation2 + $0xb2] sm:$0xff] }
 0x15f   : > { %1148 = vmatmul.bf16.gmra.mxu1 %v3866_v38 }
 0x160   : > { %v434_v19 = vpop.f32.mrf.mxu0  ;;  %v3874_v41 = vpop.f32.mrf.mxu3 }
 0x161   : > { %v435_v46 = vadd.f32 %v3630_v1, %v434_v19 }
 0x162   : > { %v1200_v47 = vpop.f32.mrf.mxu2 }
 0x163   : > { %v480_v50 = vmax.f32 %v435_v46, 0.0  ;;  %v596_v46 = vld [vmem:[#allocation2 + $0x21] sm:$0xff] }
 0x164   : > { %v1111_v52 = vpop.f32.mrf.mxu1  ;;  %v775_v60 = vld [vmem:[#allocation2 + $0x120] sm:$0xff] }
 0x165   : > { %552 = vst [vmem:[#allocation2 + $0x129] sm:$0xff] %v480_v50  ;;  %1286 = vmatmul.bf16.gmra.mxu3 %v3877_v51  ;;  %v3880_v53 = vadd.f32 %v1200_v47, %v1111_v52  ;;  %v883_v54 = vpack.c.bf16 %v480_v50, %v479_v28  ;;  %v595_v52 = vld [vmem:[#allocation2 + $0x19] sm:$0xff] }
 0x167   : > { %1242 = vmatmul.bf16.gmra.mxu2 %v883_v54  ;;  %v661_v54 = vpack.c.bf16 %v596_v46, %v595_v52  ;;  %v600_v52 = vld [vmem:[#allocation2 + $0x51] sm:$0xff] }
 0x168   : > { %v3882_v56 = vpop.f32.mrf.mxu3  ;;  %v3884_v57 = vpop.f32.mrf.mxu0 }
 0x16a   : > { %v1203_v58 = vpop.f32.mrf.mxu2 }
 0x16b   : > { %1549 = vmatmul.bf16.gmra.mxu0 %v3791_v32  ;;  %v659_v32 = vpack.c.bf16 %v626_v55, %v625_v8  ;;  %v3315_v55 = vld [vmem:[%s4700_s3 + $0x1a8] sm:$0xff] }
 0x16c   : > { %v1114_v1 = vpop.f32.mrf.mxu1  ;;  %v776_v62 = vld [vmem:[#allocation2 + $0x128] sm:$0xff]  ;;  %2108 = vmatpush.bf16.msra.mxu3 %v3315_v55 }
 0x16d   : > { %v3887_v63 = vpack.c.bf16 %v776_v62, %v775_v60  ;;  %v3889_v0 = vadd.f32 %v1203_v58, %v1114_v1  ;;  %v828_v62 = vld [vmem:[#allocation2 + $0x9a] sm:$0xff] }
 0x16f   : > { %1153 = vmatmul.bf16.gmra.mxu1 %v3887_v63 }
 0x170   : > { %v3892_v44 = vpop.f32.mrf.mxu3  ;;  %v3894_v5 = vpop.f32.mrf.mxu0 }
 0x172   : > { %v1205_v9 = vpop.f32.mrf.mxu2 }
 0x174   : > { %v1116_v13 = vpop.f32.mrf.mxu1 }
 0x175   : > { %1291 = vmatmul.bf16.gmra.mxu3 %v3896_v10  ;;  %v3899_v14 = vadd.f32 %v1205_v9, %v1116_v13  ;;  %v598_v13 = vld [vmem:[#allocation2 + $0x39] sm:$0xff] }
 0x177   : > { %1687 = vmatmul.bf16.vlgmr.msrb.gmra.mxu2 %v659_v32 }
 0x178   : > { %v3904_v4 = vpop.f32.mrf.mxu3  ;;  %v3906_v17 = vpop.f32.mrf.mxu0 }
 0x17a   : > { %v1208_v21 = vpop.f32.mrf.mxu2 }
 0x17b   : > { %1554 = vmatmul.bf16.gmra.mxu0 %v3807_v49  ;;  %v826_v49 = vld [vmem:[#allocation2 + $0x82] sm:$0xff] }
 0x17c   : > { %v1119_v25 = vpop.f32.mrf.mxu1  ;;  %v3921_v36 = vpack.c.bf16 %v826_v49, %v825_v34 }
 0x17d   : > { %v3912_v27 = vadd.f32 %v1208_v21, %v1119_v25  ;;  %v3323_v21 = vld [vmem:[%s4700_s3 + $0x1e8] sm:$0xff] }
 0x17e   : > { %2197 = vmatpush.bf16.msra.mxu0 %v3323_v21  ;;  %v588_v21 = vld [vmem:[#allocation2 + $0x140] sm:$0xff] }
 0x17f   : > { %1598 = vmatmul.bf16.vlgmr.msrb.gmra.mxu1 %v658_v16  ;;  %v3958_v16 = vpack.c.bf16 %v598_v13, %v597_v20  ;;  %v587_v20 = vld [vmem:[#allocation2 + $0x138] sm:$0xff] }
 0x180   : > { %v3917_v33 = vpop.f32.mrf.mxu3  ;;  %v3919_v28 = vpop.f32.mrf.mxu0 }
 0x182   : > { %v1210_v35 = vpop.f32.mrf.mxu2 }
 0x184   : > { %v1121_v37 = vpop.f32.mrf.mxu1 }
 0x185   : > { %1296 = vmatmul.bf16.gmra.mxu3 %v3921_v36  ;;  %v3924_v40 = vadd.f32 %v1210_v35, %v1121_v37 }
 0x187   : > { %1692 = vmatmul.bf16.gmra.mxu2 %v3819_v29  ;;  %v827_v29 = vld [vmem:[#allocation2 + $0x92] sm:$0xff] }
 0x188   : > { %v1248_v19 = vpop.f32.mrf.mxu3  ;;  %v3927_v42 = vpop.f32.mrf.mxu0  ;;  %v3940_v7 = vpack.c.bf16 %v828_v62, %v827_v29 }
 0x189   : > { %v3930_v43 = vadd.f32 %v1248_v19, %v3830_v3 }
 0x18a   : > { %v1213_v47 = vpop.f32.mrf.mxu2 }
 0x18b   : > { %1559 = vmatmul.bf16.gmra.mxu0 %v3837_v11 }
 0x18c   : > { %v1124_v50 = vpop.f32.mrf.mxu1 }
 0x18d   : > { %v3933_v58 = vadd.f32 %v1213_v47, %v1124_v50 }
 0x18f   : > { %1603 = vmatmul.bf16.gmra.mxu1 %v661_v54 }
 0x190   : > { %v1250_v1 = vpop.f32.mrf.mxu3  ;;  %v3935_v60 = vpop.f32.mrf.mxu0 }
 0x191   : > { %v3938_v2 = vadd.f32 %v1250_v1, %v3845_v15  ;;  %v599_v1 = vld [vmem:[#allocation2 + $0x49] sm:$0xff] }
 0x192   : > { %v1215_v3 = vpop.f32.mrf.mxu2  ;;  %v3983_v29 = vpack.c.bf16 %v600_v52, %v599_v1 }
 0x193   : > { %4704 = vst [vmem:[#allocation3_spill] sm:$0xff] %v3938_v2 }
 0x194   : > { %v1126_v8 = vpop.f32.mrf.mxu1 }
 0x195   : > { %1301 = vmatmul.bf16.gmra.mxu3 %v3940_v7  ;;  %v3943_v11 = vadd.f32 %v1215_v3, %v1126_v8  ;;  %v832_v8 = vld [vmem:[#allocation2 + $0xca] sm:$0xff] }
 0x197   : > { %1697 = vmatmul.bf16.gmra.mxu2 %v3851_v22 }
 0x198   : > { %v1253_v9 = vpop.f32.mrf.mxu3  ;;  %v3949_v32 = vpop.f32.mrf.mxu0 }
 0x199   : > { %v3952_v15 = vadd.f32 %v1253_v9, %v3859_v30  ;;  %v3331_v30 = vld [vmem:[%s4700_s3 + $0x228] sm:$0xff] }
 0x19a   : > { %v1218_v6 = vpop.f32.mrf.mxu2  ;;  %2286 = vmatpush.bf16.msra.mxu1 %v3331_v30 }
 0x19b   : > { %4705 = vst [vmem:[#allocation4_spill] sm:$0xff] %v3952_v15  ;;  %1564 = vmatmul.bf16.gmra.mxu0 %v3866_v38  ;;  %v829_v38 = vld [vmem:[#allocation2 + $0xaa] sm:$0xff]  ;;  %v842_v15 = vld [vmem:[#allocation2 + $0x142] sm:$0xff] }
 0x19c   : > { %v1129_v18 = vpop.f32.mrf.mxu1  ;;  %v3971_v35 = vpack.c.bf16 %v830_v31, %v829_v38  ;;  %v696_v38 = vpack.c.bf16 %v588_v21, %v587_v20  ;;  %v4008_v31 = vld [vmem:[#allocation2 + $0x61] sm:$0xff]  ;;  %v589_v21 = vld [vmem:[#allocation2 + $0x150] sm:$0xff] }
 0x19d   : > { %v3960_v22 = vadd.f32 %v1218_v6, %v1129_v18  ;;  %v3314_v18 = vld [vmem:[%s4700_s3 + $0x1a0] sm:$0xff]  ;;  %v670_v52 = vpack.c.bf16 %v3713_v24, %v4008_v31 }
 0x19e   : > { %2109 = vmatpush.bf16.msra.mxu3 %v3314_v18 }
 0x19f   : > { %1608 = vmatmul.bf16.gmra.mxu1 %v3958_v16 }
 0x1a0   : > { %v1255_v25 = vpop.f32.mrf.mxu3  ;;  %v3966_v26 = vpop.f32.mrf.mxu0 }
 0x1a1   : > { %v3969_v34 = vadd.f32 %v1255_v25, %v3874_v41 }
 0x1a2   : > { %v1220_v49 = vpop.f32.mrf.mxu2 }
 0x1a3   : > { %4706 = vst [vmem:[#allocation5_spill] sm:$0xff] %v3969_v34 }
 0x1a4   : > { %v1131_v37 = vpop.f32.mrf.mxu1 }
 0x1a5   : > { %1306 = vmatmul.bf16.gmra.mxu3 %v3971_v35  ;;  %v3974_v19 = vadd.f32 %v1220_v49, %v1131_v37  ;;  %v3321_v37 = vld [vmem:[%s4700_s3 + $0x1d8] sm:$0xff] }
 0x1a7   : > { %1702 = vmatmul.bf16.gmra.mxu2 %v3877_v51  ;;  %v831_v51 = vld [vmem:[#allocation2 + $0xc2] sm:$0xff] }
 0x1a8   : > { %v1258_v46 = vpop.f32.mrf.mxu3  ;;  %v3980_v50 = vpop.f32.mrf.mxu0  ;;  %v3993_v13 = vpack.c.bf16 %v832_v8, %v831_v51  ;;  %v834_v51 = vld [vmem:[#allocation2 + $0xe2] sm:$0xff] }
 0x1a9   : > { %v3978_v47 = vadd.f32 %v1258_v46, %v3882_v56 }
 0x1aa   : > { %v1223_v41 = vpop.f32.mrf.mxu2 }
 0x1ab   : > { %4707 = vst [vmem:[#allocation6_spill] sm:$0xff] %v3978_v47  ;;  %1569 = vmatmul.bf16.gmra.mxu0 %v3887_v63 }
 0x1ac   : > { %v1134_v54 = vpop.f32.mrf.mxu1 }
 0x1ad   : > { %v3985_v62 = vadd.f32 %v1223_v41, %v1134_v54  ;;  %v3320_v54 = vld [vmem:[%s4700_s3 + $0x1d0] sm:$0xff] }
 0x1af   : > { %1613 = vmatmul.bf16.gmra.mxu1 %v3983_v29 }
 0x1b0   : > { %v1260_v3 = vpop.f32.mrf.mxu3  ;;  %v3991_v9 = vpop.f32.mrf.mxu0 }
 0x1b1   : > { %v3989_v56 = vadd.f32 %v1260_v3, %v3892_v44  ;;  %v3322_v44 = vld [vmem:[%s4700_s3 + $0x1e0] sm:$0xff] }
 0x1b2   : > { %v1225_v55 = vpop.f32.mrf.mxu2  ;;  %2198 = vmatpush.bf16.msra.mxu0 %v3322_v44  ;;  %v833_v3 = vld [vmem:[#allocation2 + $0xda] sm:$0xff] }
 0x1b3   : > { %4708 = vst [vmem:[#allocation7_spill] sm:$0xff] %v3989_v56  ;;  %v590_v44 = vld [vmem:[#allocation2 + $0x158] sm:$0xff] }
 0x1b4   : > { %v1136_v63 = vpop.f32.mrf.mxu1 }
 0x1b5   : > { %1311 = vmatmul.bf16.gmra.mxu3 %v3993_v13  ;;  %v3996_v6 = vadd.f32 %v1225_v55, %v1136_v63  ;;  %v4028_v55 = vpack.c.bf16 %v834_v51, %v833_v3  ;;  %v3319_v63 = vld [vmem:[%s4700_s3 + $0x1c8] sm:$0xff]  ;;  %v835_v3 = vld [vmem:[#allocation2 + $0xf2] sm:$0xff]  ;;  %v836_v51 = vld [vmem:[#allocation2 + $0xfa] sm:$0xff] }
 0x1b6   : > { %2199 = vmatpush.bf16.msra.mxu0 %v3321_v37  ;;  %v699_v37 = vpack.c.bf16 %v590_v44, %v589_v21 }
 0x1b7   : > { %1707 = vmatmul.bf16.gmra.mxu2 %v3896_v10 }
 0x1b8   : > { %v1263_v30 = vpop.f32.mrf.mxu3  ;;  %v4013_v46 = vpop.f32.mrf.mxu0 }
 0x1b9   : > { %v4006_v25 = vadd.f32 %v1263_v30, %v3904_v4  ;;  %v3330_v4 = vld [vmem:[%s4700_s3 + $0x220] sm:$0xff] }
 0x1ba   : > { %v1228_v49 = vpop.f32.mrf.mxu2  ;;  %2287 = vmatpush.bf16.msra.mxu1 %v3330_v4  ;;  %2200 = vmatpush.bf16.msra.mxu0 %v3320_v54 }
 0x1bb   : > { %4709 = vst [vmem:[#allocation8_spill] sm:$0xff] %v4006_v25  ;;  %1574 = vmatmul.bf16.gmra.mxu0 %v696_v38 }
 0x1bc   : > { %v1139_v10 = vpop.f32.mrf.mxu1 }
 0x1bd   : > { %v4017_v41 = vadd.f32 %v1228_v49, %v1139_v10  ;;  %v4045_v10 = vld [vmem:[#allocation2 + $0x79] sm:$0xff] }
 0x1be   : > { %2201 = vmatpush.bf16.msra.mxu0 %v3319_v63  ;;  %v673_v54 = vpack.c.bf16 %v3728_v45, %v4045_v10  ;;  %v3313_v45 = vld [vmem:[%s4700_s3 + $0x198] sm:$0xff] }
 0x1bf   : > { %1618 = vmatmul.bf16.gmra.mxu1 %v670_v52  ;;  %2110 = vmatpush.bf16.msra.mxu3 %v3313_v45  ;;  %v838_v45 = vld [vmem:[#allocation2 + $0x112] sm:$0xff] }
 0x1c0   : > { %v1265_v1 = vpop.f32.mrf.mxu3  ;;  %v4036_v30 = vpop.f32.mrf.mxu0 }
 0x1c1   : > { %v4026_v8 = vadd.f32 %v1265_v1, %v3917_v33  ;;  %v3318_v33 = vld [vmem:[%s4700_s3 + $0x1c0] sm:$0xff] }
 0x1c2   : > { %v1230_v24 = vpop.f32.mrf.mxu2  ;;  %2202 = vmatpush.bf16.msra.mxu0 %v3318_v33  ;;  %v591_v33 = vld [vmem:[#allocation2 + $0x168] sm:$0xff] }
 0x1c3   : > { %4710 = vst [vmem:[#allocation9_spill] sm:$0xff] %v4026_v8 }
 0x1c4   : > { %v1141_v18 = vpop.f32.mrf.mxu1 }
 0x1c5   : > { %1316 = vmatmul.bf16.gmra.mxu3 %v4028_v55  ;;  %v4034_v20 = vadd.f32 %v1230_v24, %v1141_v18  ;;  %v4056_v18 = vpack.c.bf16 %v836_v51, %v835_v3 }
 0x1c7   : > { %1712 = vmatmul.bf16.gmra.mxu2 %v3921_v36 }
 0x1c8   : > { %v1277_v38 = vpop.f32.mrf.mxu3  ;;  %v4051_v24 = vpop.f32.mrf.mxu0 }
 0x1c9   : > { %v4043_v49 = vadd.f32 %v1277_v38, %v3809_v48  ;;  %v592_v38 = vld [vmem:[#allocation2 + $0x170] sm:$0xff] }
 0x1ca   : > { %v1233_v52 = vpop.f32.mrf.mxu2 }
 0x1cb   : > { %1579 = vmatmul.bf16.gmra.mxu0 %v699_v37 }
 0x1cc   : > { %v1144_v4 = vpop.f32.mrf.mxu1 }
 0x1cd   : > { %v4049_v1 = vadd.f32 %v1233_v52, %v1144_v4  ;;  %v702_v52 = vpack.c.bf16 %v592_v38, %v591_v33  ;;  %v4068_v4 = vld [vmem:[#allocation2 + $0x91] sm:$0xff] }
 0x1ce   : > { %v676_v51 = vpack.c.bf16 %v3743_v59, %v4068_v4 }
 0x1cf   : > { %1623 = vmatmul.bf16.gmra.mxu1 %v673_v54 }
 0x1d0   : > { %v1279_v36 = vpop.f32.mrf.mxu3 }
 0x1d1   : > { %v4054_v48 = vadd.f32 %v1279_v36, %v3822_v61  ;;  %v4070_v36 = vpop.f32.mrf.mxu0 }
 0x1d2   : > { %v1235_v63 = vpop.f32.mrf.mxu2 }
 0x1d4   : > { %v1146_v21 = vpop.f32.mrf.mxu1 }
 0x1d5   : > { %1321 = vmatmul.bf16.gmra.mxu3 %v4056_v18  ;;  %v4059_v44 = vadd.f32 %v1235_v63, %v1146_v21  ;;  %v837_v21 = vld [vmem:[#allocation2 + $0x10a] sm:$0xff] }
 0x1d7   : > { %1717 = vmatmul.bf16.gmra.mxu2 %v3940_v7  ;;  %v3329_v7 = vld [vmem:[%s4700_s3 + $0x218] sm:$0xff] }
 0x1d8   : > { %v1282_v37 = vpop.f32.mrf.mxu3  ;;  %2288 = vmatpush.bf16.msra.mxu1 %v3329_v7 }
 0x1d9   : > { %v4066_v61 = vadd.f32 %v1282_v37, %v3839_v12  ;;  %v4082_v37 = vpack.c.bf16 %v838_v45, %v837_v21  ;;  %v4084_v8 = vpop.f32.mrf.mxu0 }
 0x1da   : > { %v1238_v54 = vpop.f32.mrf.mxu2 }
 0x1db   : > { %1584 = vmatmul.bf16.gmra.mxu0 %v702_v52 }
 0x1dc   : > { %v1149_v3 = vpop.f32.mrf.mxu1 }
 0x1dd   : > { %v4074_v63 = vadd.f32 %v1238_v54, %v1149_v3 }
 0x1df   : > { %1628 = vmatmul.bf16.gmra.mxu1 %v676_v51  ;;  %v608_v51 = vld [vmem:[#allocation2 + $0xb1] sm:$0xff] }
 0x1e0   : > { %v1284_v12 = vpop.f32.mrf.mxu3 }
 0x1e1   : > { %v4080_v33 = vadd.f32 %v1284_v12, %v3854_v23  ;;  %v607_v12 = vld [vmem:[#allocation2 + $0xa9] sm:$0xff]  ;;  %v4098_v25 = vpop.f32.mrf.mxu0 }
 0x1e2   : > { %v1240_v38 = vpop.f32.mrf.mxu2  ;;  %v4094_v21 = vpack.c.bf16 %v608_v51, %v607_v12  ;;  %v3312_v12 = vld [vmem:[%s4700_s3 + $0x190] sm:$0xff] }
 0x1e3   : > { %2111 = vmatpush.bf16.msra.mxu3 %v3312_v12  ;;  %v841_v12 = vld [vmem:[#allocation2 + $0x13a] sm:$0xff] }
 0x1e4   : > { %v1151_v52 = vpop.f32.mrf.mxu1 }
 0x1e5   : > { %1326 = vmatmul.bf16.gmra.mxu3 %v4082_v37  ;;  %v4087_v59 = vadd.f32 %v1240_v38, %v1151_v52  ;;  %v839_v38 = vld [vmem:[#allocation2 + $0x122] sm:$0xff]  ;;  %v840_v52 = vld [vmem:[#allocation2 + $0x12a] sm:$0xff] }
 0x1e6   : > { %v4107_v51 = vpack.c.bf16 %v840_v52, %v839_v38  ;;  %v1511_v38 = vadd.f32 %v3884_v57, %v4043_v49 }
 0x1e7   : > { %1722 = vmatmul.bf16.gmra.mxu2 %v3971_v35  ;;  %v3341_v35 = vld [vmem:[%s4702_s5 + $0x38] sm:$0xff] }
 0x1e8   : > { %v1287_v54 = vpop.f32.mrf.mxu3  ;;  %2553 = vmatpush.bf16.msra.mxu2 %v3341_v35  ;;  %v610_v35 = vld [vmem:[#allocation2 + $0xc9] sm:$0xff] }
 0x1e9   : > { %v4091_v3 = vadd.f32 %v1287_v54, %v3868_v39  ;;  %v4116_v47 = vpop.f32.mrf.mxu0 }
 0x1ea   : > { %v1243_v23 = vpop.f32.mrf.mxu2 }
 0x1eb   : > { %2203 = vmatmul.bf16.vlgmr.msra.gmra.mxu0 %v3958_v16 }
 0x1ec   : > { %v1154_v7 = vpop.f32.mrf.mxu1 }
 0x1ed   : > { %v4096_v45 = vadd.f32 %v1243_v23, %v1154_v7 }
 0x1ef   : > { %1633 = vmatmul.bf16.gmra.mxu1 %v4094_v21 }
 0x1f0   : > { %v1289_v39 = vpop.f32.mrf.mxu3 }
 0x1f1   : > { %v4105_v54 = vadd.f32 %v1289_v39, %v3880_v53  ;;  %v4135_v49 = vpop.f32.mrf.mxu0 }
 0x1f2   : > { %v1245_v16 = vpop.f32.mrf.mxu2 }
 0x1f4   : > { %v1156_v23 = vpop.f32.mrf.mxu1 }
 0x1f5   : > { %1331 = vmatmul.bf16.gmra.mxu3 %v4107_v51  ;;  %v4110_v7 = vadd.f32 %v1245_v16, %v1156_v23  ;;  %v609_v16 = vld [vmem:[#allocation2 + $0xc1] sm:$0xff] }
 0x1f6   : > { %v4124_v34 = vpack.c.bf16 %v610_v35, %v609_v16  ;;  %v1513_v35 = vadd.f32 %v3894_v5, %v4054_v48  ;;  %v1806_v16 = vld [vmem:[#allocation2 + $0x69] sm:$0xff]  ;;  %v1516_v5 = vadd.f32 %v3906_v17, %v4066_v61  ;;  %v611_v48 = vld [vmem:[#allocation2 + $0xd9] sm:$0xff] }
 0x1f7   : > { %1727 = vmatmul.bf16.gmra.mxu2 %v3993_v13 }
 0x1f8   : > { %v1292_v56 = vpop.f32.mrf.mxu3 }
 0x1f9   : > { %v4119_v53 = vadd.f32 %v1292_v56, %v3889_v0  ;;  %v3328_v0 = vld [vmem:[%s4700_s3 + $0x210] sm:$0xff] }
 0x1fa   : > { %v1688_v39 = vpop.f32.mrf.mxu2  ;;  %2289 = vmatpush.bf16.msra.mxu1 %v3328_v0 }
 0x1fb   : > { %2208 = vmatmul.bf16.gmra.mxu0 %v3983_v29 }
 0x1fc   : > { %v1599_v52 = vpop.f32.mrf.mxu1 }
 0x1fd   : > { %v1600_v23 = vadd.f32 %v1599_v52, %v1511_v38  ;;  %v4139_v38 = vpack.c.bf16 %v842_v15, %v841_v12  ;;  %v4151_v12 = vpop.f32.mrf.mxu0 }
 0x1ff   : > { %1638 = vmatmul.bf16.gmra.mxu1 %v4124_v34  ;;  %v4127_v13 = vadd.f32 %v1688_v39, %v1600_v23 }
 0x200   : > { %v1294_v56 = vpop.f32.mrf.mxu3 }
 0x201   : > { %4711 = vst [vmem:[#allocation10_spill] sm:$0xff] %v4127_v13  ;;  %v4133_v29 = vadd.f32 %v1294_v56, %v3899_v14  ;;  %v1872_v56 = vpack.c.bf16 %v1806_v16, %v4008_v31  ;;  %v612_v13 = vld [vmem:[#allocation2 + $0xe1] sm:$0xff] }
 0x202   : > { %v1690_v57 = vpop.f32.mrf.mxu2 }
 0x204   : > { %v1601_v39 = vpop.f32.mrf.mxu1 }
 0x205   : > { %v1602_v52 = vadd.f32 %v1601_v39, %v1513_v35  ;;  %1336 = vmatmul.bf16.gmra.mxu3 %v4139_v38  ;;  %v4153_v35 = vpack.c.bf16 %v612_v13, %v611_v48  ;;  %v843_v39 = vld [vmem:[#allocation2 + $0x152] sm:$0xff]  ;;  %v1518_v13 = vadd.f32 %v3919_v28, %v4080_v33 }
 0x207   : > { %v4142_v23 = vadd.f32 %v1690_v57, %v1602_v52  ;;  %1732 = vmatmul.bf16.gmra.mxu2 %v4028_v55  ;;  %v844_v52 = vld [vmem:[#allocation2 + $0x15a] sm:$0xff] }
 0x208   : > { %v1297_v14 = vpop.f32.mrf.mxu3  ;;  %v4166_v16 = vpack.c.bf16 %v844_v52, %v843_v39  ;;  %v613_v52 = vld [vmem:[#allocation2 + $0xf1] sm:$0xff] }
 0x209   : > { %v4146_v0 = vadd.f32 %v1297_v14, %v3912_v27  ;;  %v3340_v27 = vld [vmem:[%s4702_s5 + $0x30] sm:$0xff] }
 0x20a   : > { %v1693_v2 = vpop.f32.mrf.mxu2  ;;  %2554 = vmatpush.bf16.msra.mxu2 %v3340_v27 }
 0x20b   : > { %2213 = vmatmul.bf16.gmra.mxu0 %v1872_v56  ;;  %v3311_v56 = vld [vmem:[%s4700_s3 + $0x188] sm:$0xff] }
 0x20c   : > { %v1604_v15 = vpop.f32.mrf.mxu1  ;;  %2112 = vmatpush.bf16.msra.mxu3 %v3311_v56 }
 0x20d   : > { %v1605_v57 = vadd.f32 %v1604_v15, %v1516_v5  ;;  %v1808_v5 = vld [vmem:[#allocation2 + $0x81] sm:$0xff]  ;;  %v4172_v15 = vpop.f32.mrf.mxu0 }
 0x20e   : > { %v1875_v33 = vpack.c.bf16 %v1808_v5, %v4045_v10 }
 0x20f   : > { %1643 = vmatmul.bf16.gmra.mxu1 %v4153_v35  ;;  %v4156_v55 = vadd.f32 %v1693_v2, %v1605_v57  ;;  %v614_v57 = vld [vmem:[#allocation2 + $0xf9] sm:$0xff] }
 0x210   : > { %v1299_v31 = vpop.f32.mrf.mxu3 }
 0x211   : > { %v4162_v17 = vadd.f32 %v1299_v31, %v3924_v40  ;;  %v1521_v31 = vadd.f32 %v3927_v42, %v4091_v3  ;;  %v3310_v3 = vld [vmem:[%s4700_s3 + $0x180] sm:$0xff] }
 0x212   : > { %v1695_v61 = vpop.f32.mrf.mxu2  ;;  %2113 = vmatpush.bf16.msra.mxu3 %v3310_v3 }
 0x214   : > { %v1606_v14 = vpop.f32.mrf.mxu1 }
 0x215   : > { %v1607_v2 = vadd.f32 %v1606_v14, %v1518_v13  ;;  %1341 = vmatmul.bf16.gmra.mxu3 %v4166_v16  ;;  %v845_v14 = vld [vmem:[#allocation2 + $0x16a] sm:$0xff]  ;;  %v4191_v56 = vpop.f32.mrf.mxu0 }
 0x217   : > { %v4174_v40 = vadd.f32 %v1695_v61, %v1607_v2  ;;  %1737 = vmatmul.bf16.gmra.mxu2 %v4056_v18  ;;  %v4183_v61 = vpack.c.bf16 %v614_v57, %v613_v52  ;;  %v846_v2 = vld [vmem:[#allocation2 + $0x172] sm:$0xff] }
 0x218   : > { %v1302_v48 = vpop.f32.mrf.mxu3 }
 0x219   : > { %v4178_v28 = vadd.f32 %v1302_v48, %v3933_v58  ;;  %v3327_v58 = vld [vmem:[%s4700_s3 + $0x208] sm:$0xff]  ;;  %v1523_v48 = vadd.f32 %v3935_v60, %v4105_v54 }
 0x21a   : > { %v1698_v27 = vpop.f32.mrf.mxu2  ;;  %2290 = vmatpush.bf16.msra.mxu1 %v3327_v58  ;;  %v616_v58 = vld [vmem:[#allocation2 + $0x111] sm:$0xff] }
 0x21b   : > { %2218 = vmatmul.bf16.gmra.mxu0 %v1875_v33  ;;  %v4201_v33 = vpack.c.bf16 %v846_v2, %v845_v14  ;;  %v615_v2 = vld [vmem:[#allocation2 + $0x109] sm:$0xff] }
 0x21c   : > { %v1609_v39 = vpop.f32.mrf.mxu1 }
 0x21d   : > { %v1610_v13 = vadd.f32 %v1609_v39, %v1521_v31  ;;  %v1810_v31 = vld [vmem:[#allocation2 + $0x99] sm:$0xff]  ;;  %v4211_v54 = vpop.f32.mrf.mxu0 }
 0x21f   : > { %1648 = vmatmul.bf16.gmra.mxu1 %v4183_v61  ;;  %v4186_v18 = vadd.f32 %v1698_v27, %v1610_v13  ;;  %v1878_v13 = vpack.c.bf16 %v1810_v31, %v4068_v4 }
 0x220   : > { %v1304_v10 = vpop.f32.mrf.mxu3 }
 0x221   : > { %v4194_v42 = vadd.f32 %v1304_v10, %v3943_v11  ;;  %v1526_v10 = vadd.f32 %v3949_v32, %v4119_v53  ;;  %v1528_v53 = vadd.f32 %v3966_v26, %v4133_v29  ;;  %v1531_v26 = vadd.f32 %v3980_v50, %v4146_v0  ;;  %v1769_v50 = vld [vmem:[#allocation2 + $0x30] sm:$0xff] }
 0x222   : > { %v1700_v5 = vpop.f32.mrf.mxu2 }
 0x224   : > { %v1611_v57 = vpop.f32.mrf.mxu1 }
 0x225   : > { %v1612_v27 = vadd.f32 %v1611_v57, %v1523_v48  ;;  %1346 = vmatmul.bf16.gmra.mxu3 %v4201_v33  ;;  %v847_v48 = vld [vmem:[#allocation2 + $0x182] sm:$0xff]  ;;  %v848_v57 = vld [vmem:[#allocation2 + $0x18a] sm:$0xff] }
 0x226   : > { %v896_v31 = vpack.c.bf16 %v848_v57, %v847_v48 }
 0x227   : > { %v4204_v39 = vadd.f32 %v1700_v5, %v1612_v27  ;;  %1742 = vmatmul.bf16.gmra.mxu2 %v4082_v37  ;;  %v4215_v5 = vpack.c.bf16 %v616_v58, %v615_v2 }
 0x228   : > { %v1307_v11 = vpop.f32.mrf.mxu3 }
 0x229   : > { %v4208_v52 = vadd.f32 %v1307_v11, %v3960_v22  ;;  %v3339_v22 = vld [vmem:[%s4702_s5 + $0x28] sm:$0xff] }
 0x22a   : > { %v1703_v60 = vpop.f32.mrf.mxu2  ;;  %2555 = vmatpush.bf16.msra.mxu2 %v3339_v22 }
 0x22b   : > { %2223 = vmatmul.bf16.gmra.mxu0 %v1878_v13  ;;  %v4228_v13 = vpop.f32.mrf.mxu0 }
 0x22c   : > { %v1614_v14 = vpop.f32.mrf.mxu1 }
 0x22d   : > { %v1615_v3 = vadd.f32 %v1614_v14, %v1526_v10 }
 0x22f   : > { %1653 = vmatmul.bf16.gmra.mxu1 %v4215_v5  ;;  %v4218_v37 = vadd.f32 %v1703_v60, %v1615_v3  ;;  %v617_v3 = vld [vmem:[#allocation2 + $0x121] sm:$0xff] }
 0x230   : > { %v1309_v4 = vpop.f32.mrf.mxu3 }
 0x231   : > { %v4224_v27 = vadd.f32 %v1309_v4, %v3974_v19  ;;  %v618_v19 = vld [vmem:[#allocation2 + $0x129] sm:$0xff] }
 0x232   : > { %v1705_v32 = vpop.f32.mrf.mxu2  ;;  %v4239_v4 = vpack.c.bf16 %v618_v19, %v617_v3 }
 0x233   : > { %v4241_v48 = vpop.f32.mrf.mxu0 }
 0x234   : > { %v1616_v11 = vpop.f32.mrf.mxu1 }
 0x235   : > { %v1617_v58 = vadd.f32 %v1616_v11, %v1528_v53  ;;  %1351 = vmatmul.bf16.gmra.mxu3 %v896_v31  ;;  %v1533_v53 = vadd.f32 %v3991_v9, %v4162_v17  ;;  %v1536_v9 = vadd.f32 %v4013_v46, %v4178_v28 }
 0x237   : > { %v4230_v60 = vadd.f32 %v1705_v32, %v1617_v58  ;;  %1747 = vmatmul.bf16.gmra.mxu2 %v4107_v51 }
 0x238   : > { %v1312_v10 = vpop.f32.mrf.mxu3 }
 0x239   : > { %v4234_v14 = vadd.f32 %v1312_v10, %v3985_v62  ;;  %v3326_v62 = vld [vmem:[%s4700_s3 + $0x200] sm:$0xff] }
 0x23a   : > { %v1708_v2 = vpop.f32.mrf.mxu2  ;;  %2291 = vmatpush.bf16.msra.mxu1 %v3326_v62 }
 0x23b   : > { %2228 = vmatmul.bf16.gmra.mxu0 %v4094_v21  ;;  %v1770_v21 = vld [vmem:[#allocation2 + $0x38] sm:$0xff]  ;;  %v4259_v19 = vpop.f32.mrf.mxu0 }
 0x23c   : > { %v1619_v29 = vpop.f32.mrf.mxu1  ;;  %v1865_v31 = vpack.c.bf16 %v1770_v21, %v1769_v50  ;;  %v1538_v50 = vadd.f32 %v4036_v30, %v4194_v42 }
 0x23d   : > { %v1620_v22 = vadd.f32 %v1619_v29, %v1531_v26  ;;  %v620_v26 = vld [vmem:[#allocation2 + $0x141] sm:$0xff] }
 0x23f   : > { %1658 = vmatmul.bf16.gmra.mxu1 %v4239_v4  ;;  %v4244_v51 = vadd.f32 %v1708_v2, %v1620_v22  ;;  %v619_v2 = vld [vmem:[#allocation2 + $0x139] sm:$0xff] }
 0x240   : > { %v1314_v57 = vpop.f32.mrf.mxu3  ;;  %v4267_v22 = vpack.c.bf16 %v620_v26, %v619_v2  ;;  %v621_v2 = vld [vmem:[#allocation2 + $0x151] sm:$0xff]  ;;  %v622_v26 = vld [vmem:[#allocation2 + $0x159] sm:$0xff] }
 0x241   : > { %v4250_v32 = vadd.f32 %v1314_v57, %v3996_v6  ;;  %v1772_v57 = vld [vmem:[#allocation2 + $0x50] sm:$0xff] }
 0x242   : > { %v4252_v0 = vpop.f32.mrf.mxu2 }
 0x243   : > { %v4280_v28 = vpop.f32.mrf.mxu0 }
 0x244   : > { %v1621_v11 = vpop.f32.mrf.mxu1 }
 0x245   : > { %v4256_v58 = vadd.f32 %v1621_v11, %v1533_v53  ;;  %2114 = vmatmul.bf16.vlgmr.msra.gmra.mxu3 %v1865_v31 }
 0x247   : > { %1752 = vmatmul.bf16.gmra.mxu2 %v4139_v38 }
 0x248   : > { %v1317_v10 = vpop.f32.mrf.mxu3 }
 0x249   : > { %v4262_v6 = vadd.f32 %v1317_v10, %v4017_v41  ;;  %v3338_v41 = vld [vmem:[%s4702_s5 + $0x20] sm:$0xff] }
 0x24a   : > { %v1713_v29 = vpop.f32.mrf.mxu2  ;;  %2556 = vmatpush.bf16.msra.mxu2 %v3338_v41  ;;  %v1774_v41 = vld [vmem:[#allocation2 + $0x68] sm:$0xff] }
 0x24b   : > { %2233 = vmatmul.bf16.gmra.mxu0 %v4124_v34  ;;  %v1771_v34 = vld [vmem:[#allocation2 + $0x48] sm:$0xff]  ;;  %v4293_v42 = vpop.f32.mrf.mxu0 }
 0x24c   : > { %v1624_v17 = vpop.f32.mrf.mxu1  ;;  %v1868_v53 = vpack.c.bf16 %v1772_v57, %v1771_v34  ;;  %v1773_v57 = vld [vmem:[#allocation2 + $0x60] sm:$0xff] }
 0x24d   : > { %v1625_v3 = vadd.f32 %v1624_v17, %v1536_v9  ;;  %v1541_v9 = vadd.f32 %v4051_v24, %v4208_v52  ;;  %v1543_v24 = vadd.f32 %v4070_v36, %v4224_v27  ;;  %v1871_v52 = vpack.c.bf16 %v1774_v41, %v1773_v57 }
 0x24e   : > { %v1546_v36 = vadd.f32 %v4084_v8, %v4234_v14  ;;  %v1775_v8 = vld [vmem:[#allocation2 + $0x78] sm:$0xff]  ;;  %v1548_v41 = vadd.f32 %v4098_v25, %v4250_v32 }
 0x24f   : > { %1663 = vmatmul.bf16.gmra.mxu1 %v4267_v22  ;;  %v4270_v38 = vadd.f32 %v1713_v29, %v1625_v3  ;;  %v4295_v3 = vpack.c.bf16 %v622_v26, %v621_v2  ;;  %v624_v2 = vld [vmem:[#allocation2 + $0x171] sm:$0xff] }
 0x250   : > { %v1319_v62 = vpop.f32.mrf.mxu3 }
 0x251   : > { %v4276_v21 = vadd.f32 %v1319_v62, %v4034_v20 }
 0x252   : > { %v4278_v46 = vpop.f32.mrf.mxu2 }
 0x254   : > { %v1626_v31 = vpop.f32.mrf.mxu1 }
 0x255   : > { %v4284_v11 = vadd.f32 %v1626_v31, %v1538_v50  ;;  %2119 = vmatmul.bf16.gmra.mxu3 %v1868_v53  ;;  %v4309_v53 = vpop.f32.mrf.mxu0 }
 0x257   : > { %1757 = vmatmul.bf16.gmra.mxu2 %v4166_v16 }
 0x258   : > { %v1322_v10 = vpop.f32.mrf.mxu3 }
 0x259   : > { %v4288_v20 = vadd.f32 %v1322_v10, %v4049_v1 }
 0x25a   : > { %v1718_v29 = vpop.f32.mrf.mxu2 }
 0x25b   : > { %2238 = vmatmul.bf16.gmra.mxu0 %v4153_v35 }
 0x25c   : > { %v1629_v30 = vpop.f32.mrf.mxu1 }
 0x25d   : > { %v1630_v17 = vadd.f32 %v1629_v30, %v1541_v9 }
 0x25f   : > { %1668 = vmatmul.bf16.gmra.mxu1 %v4295_v3  ;;  %v4298_v16 = vadd.f32 %v1718_v29, %v1630_v17  ;;  %v1776_v17 = vld [vmem:[#allocation2 + $0x80] sm:$0xff] }
 0x260   : > { %v1324_v1 = vpop.f32.mrf.mxu3  ;;  %v1874_v57 = vpack.c.bf16 %v1776_v17, %v1775_v8  ;;  %v1777_v17 = vld [vmem:[#allocation2 + $0x90] sm:$0xff] }
 0x261   : > { %v4301_v62 = vadd.f32 %v1324_v1, %v4059_v44  ;;  %v623_v44 = vld [vmem:[#allocation2 + $0x169] sm:$0xff]  ;;  %v4326_v1 = vpop.f32.mrf.mxu0 }
 0x262   : > { %v4303_v35 = vpop.f32.mrf.mxu2  ;;  %v4318_v9 = vpack.c.bf16 %v624_v2, %v623_v44  ;;  %v1833_v44 = vld [vmem:[#allocation2 + $0x32] sm:$0xff]  ;;  %v1834_v2 = vld [vmem:[#allocation2 + $0x3a] sm:$0xff] }
 0x264   : > { %v1631_v34 = vpop.f32.mrf.mxu1 }
 0x265   : > { %v4307_v50 = vadd.f32 %v1631_v34, %v1543_v24  ;;  %2124 = vmatmul.bf16.gmra.mxu3 %v1871_v52 }
 0x267   : > { %1762 = vmatmul.bf16.gmra.mxu2 %v4201_v33 }
 0x268   : > { %v1327_v31 = vpop.f32.mrf.mxu3 }
 0x269   : > { %v4313_v10 = vadd.f32 %v1327_v31, %v4074_v63  ;;  %v3337_v63 = vld [vmem:[%s4702_s5 + $0x18] sm:$0xff] }
 0x26a   : > { %v1723_v26 = vpop.f32.mrf.mxu2  ;;  %2557 = vmatpush.bf16.msra.mxu2 %v3337_v63 }
 0x26b   : > { %2243 = vmatmul.bf16.gmra.mxu0 %v4183_v61 }
 0x26c   : > { %v1634_v27 = vpop.f32.mrf.mxu1 }
 0x26d   : > { %v1635_v29 = vadd.f32 %v1634_v27, %v1546_v36  ;;  %v1551_v36 = vadd.f32 %v4116_v47, %v4262_v6  ;;  %v1867_v27 = vpack.c.bf16 %v1834_v2, %v1833_v44  ;;  %v1835_v44 = vld [vmem:[#allocation2 + $0x4a] sm:$0xff] }
 0x26f   : > { %1673 = vmatmul.bf16.gmra.mxu1 %v4318_v9  ;;  %v4321_v30 = vadd.f32 %v1723_v26, %v1635_v29  ;;  %v4340_v26 = vpop.f32.mrf.mxu0 }
 0x270   : > { %v1329_v33 = vpop.f32.mrf.mxu3 }
 0x271   : > { %v4329_v61 = vadd.f32 %v1329_v33, %v4087_v59  ;;  %v1778_v33 = vld [vmem:[#allocation2 + $0x98] sm:$0xff] }
 0x272   : > { %v4331_v14 = vpop.f32.mrf.mxu2 }
 0x274   : > { %v1636_v24 = vpop.f32.mrf.mxu1 }
 0x275   : > { %v4335_v52 = vadd.f32 %v1636_v24, %v1548_v41  ;;  %2129 = vmatmul.bf16.gmra.mxu3 %v1874_v57  ;;  %v1877_v41 = vpack.c.bf16 %v1778_v33, %v1777_v17  ;;  %v4712_v33 = vld [vmem:[#allocation3_spill] sm:$0xff] }
 0x277   : > { %v4354_v47 = vpop.f32.mrf.mxu0 }
 0x278   : > { %v1332_v34 = vpop.f32.mrf.mxu3 }
 0x279   : > { %v4338_v31 = vadd.f32 %v1332_v34, %v4096_v45 }
 0x27a   : > { %v1728_v59 = vpop.f32.mrf.mxu2 }
 0x27b   : > { %2248 = vmatmul.bf16.gmra.mxu0 %v4215_v5  ;;  %v1553_v5 = vadd.f32 %v4135_v49, %v4276_v21 }
 0x27c   : > { %v1639_v25 = vpop.f32.mrf.mxu1 }
 0x27d   : > { %v1640_v32 = vadd.f32 %v1639_v25, %v1551_v36 }
 0x27f   : > { %2292 = vmatmul.bf16.vlgmr.msra.gmra.mxu1 %v1867_v27  ;;  %v4345_v29 = vadd.f32 %v1728_v59, %v1640_v32  ;;  %v1556_v59 = vadd.f32 %v4151_v12, %v4288_v20  ;;  %v4364_v25 = vpop.f32.mrf.mxu0  ;;  %v1558_v20 = vadd.f32 %v4172_v15, %v4301_v62 }
 0x280   : > { %v1334_v63 = vpop.f32.mrf.mxu3 }
 0x281   : > { %v4348_v45 = vadd.f32 %v1334_v63, %v4110_v7  ;;  %v1836_v7 = vld [vmem:[#allocation2 + $0x52] sm:$0xff] }
 0x282   : > { %v4350_v8 = vpop.f32.mrf.mxu2  ;;  %v1870_v36 = vpack.c.bf16 %v1836_v7, %v1835_v44  ;;  %v1780_v63 = vld [vmem:[#allocation2 + $0xb0] sm:$0xff]  ;;  %v4713_v7 = vld [vmem:[#allocation4_spill] sm:$0xff] }
 0x284   : > { %v1641_v57 = vpop.f32.mrf.mxu1 }
 0x285   : > { %v4356_v6 = vadd.f32 %v1641_v57, %v1553_v5  ;;  %2134 = vmatmul.bf16.gmra.mxu3 %v1877_v41 }
 0x287   : > { %v4380_v44 = vpop.f32.mrf.mxu0 }
 0x288   : > { %v1337_v24 = vpop.f32.mrf.mxu3 }
 0x289   : > { %v4359_v34 = vadd.f32 %v1337_v24, %v3930_v43  ;;  %v3336_v43 = vld [vmem:[%s4702_s5 + $0x10] sm:$0xff] }
 0x28a   : > { %v1733_v2 = vpop.f32.mrf.mxu2  ;;  %2558 = vmatpush.bf16.msra.mxu2 %v3336_v43 }
 0x28b   : > { %2253 = vmatmul.bf16.gmra.mxu0 %v4239_v4  ;;  %v1779_v4 = vld [vmem:[#allocation2 + $0xa8] sm:$0xff] }
 0x28c   : > { %v1644_v49 = vpop.f32.mrf.mxu1  ;;  %v1880_v5 = vpack.c.bf16 %v1780_v63, %v1779_v4  ;;  %v4714_v4 = vld [vmem:[#allocation5_spill] sm:$0xff] }
 0x28d   : > { %v1645_v21 = vadd.f32 %v1644_v49, %v1556_v59  ;;  %v1837_v59 = vld [vmem:[#allocation2 + $0x62] sm:$0xff]  ;;  %v1838_v49 = vld [vmem:[#allocation2 + $0x6a] sm:$0xff] }
 0x28e   : > { %v1873_v43 = vpack.c.bf16 %v1838_v49, %v1837_v59  ;;  %v4715_v49 = vld [vmem:[#allocation6_spill] sm:$0xff] }
 0x28f   : > { %2297 = vmatmul.bf16.gmra.mxu1 %v1870_v36  ;;  %v4366_v32 = vadd.f32 %v1733_v2, %v1645_v21  ;;  %v1561_v36 = vadd.f32 %v4191_v56, %v4313_v10 }
 0x290   : > { %v1339_v27 = vpop.f32.mrf.mxu3 }
 0x291   : > { %v4372_v17 = vadd.f32 %v1339_v27, %v4712_v33  ;;  %v1782_v33 = vld [vmem:[#allocation2 + $0xc8] sm:$0xff] }
 0x292   : > { %v4374_v12 = vpop.f32.mrf.mxu2 }
 0x294   : > { %v1646_v41 = vpop.f32.mrf.mxu1 }
 0x295   : > { %v4378_v57 = vadd.f32 %v1646_v41, %v1558_v20  ;;  %2139 = vmatmul.bf16.gmra.mxu3 %v1880_v5  ;;  %v1781_v5 = vld [vmem:[#allocation2 + $0xc0] sm:$0xff] }
 0x296   : > { %v1883_v56 = vpack.c.bf16 %v1782_v33, %v1781_v5  ;;  %v3335_v5 = vld [vmem:[%s4702_s5 + $0x8] sm:$0xff] }
 0x297   : > { %2559 = vmatpush.bf16.msra.mxu2 %v3335_v5 }
 0x298   : > { %v1342_v24 = vpop.f32.mrf.mxu3 }
 0x299   : > { %v4383_v2 = vadd.f32 %v1342_v24, %v4713_v7  ;;  %v4395_v24 = vpop.f32.mrf.mxu0 }
 0x29a   : > { %v1738_v21 = vpop.f32.mrf.mxu2 }
 0x29b   : > { %2258 = vmatmul.bf16.gmra.mxu0 %v4267_v22  ;;  %v1563_v22 = vadd.f32 %v4211_v54, %v4329_v61 }
 0x29c   : > { %v1649_v15 = vpop.f32.mrf.mxu1 }
 0x29d   : > { %v1650_v62 = vadd.f32 %v1649_v15, %v1561_v36  ;;  %v1839_v36 = vld [vmem:[#allocation2 + $0x7a] sm:$0xff]  ;;  %v1840_v15 = vld [vmem:[#allocation2 + $0x82] sm:$0xff] }
 0x29e   : > { %v1876_v61 = vpack.c.bf16 %v1840_v15, %v1839_v36 }
 0x29f   : > { %2302 = vmatmul.bf16.gmra.mxu1 %v1873_v43  ;;  %v4388_v27 = vadd.f32 %v1738_v21, %v1650_v62  ;;  %v1566_v43 = vadd.f32 %v4228_v13, %v4338_v31  ;;  %v1568_v31 = vadd.f32 %v4241_v48, %v4348_v45 }
 0x2a0   : > { %v1344_v63 = vpop.f32.mrf.mxu3 }
 0x2a1   : > { %v4391_v20 = vadd.f32 %v1344_v63, %v4714_v4  ;;  %v4407_v4 = vpop.f32.mrf.mxu0 }
 0x2a2   : > { %v4393_v41 = vpop.f32.mrf.mxu2 }
 0x2a4   : > { %v1651_v10 = vpop.f32.mrf.mxu1 }
 0x2a5   : > { %v4399_v7 = vadd.f32 %v1651_v10, %v1563_v22  ;;  %2144 = vmatmul.bf16.gmra.mxu3 %v1883_v56  ;;  %v1784_v56 = vld [vmem:[#allocation2 + $0xe0] sm:$0xff]  ;;  %v4716_v10 = vld [vmem:[#allocation7_spill] sm:$0xff] }
 0x2a8   : > { %v1347_v59 = vpop.f32.mrf.mxu3 }
 0x2a9   : > { %v4402_v21 = vadd.f32 %v1347_v59, %v4715_v49 }
 0x2aa   : > { %v1743_v62 = vpop.f32.mrf.mxu2 }
 0x2ab   : > { %2263 = vmatmul.bf16.gmra.mxu0 %v4295_v3  ;;  %v1783_v3 = vld [vmem:[#allocation2 + $0xd8] sm:$0xff] }
 0x2ac   : > { %v1654_v63 = vpop.f32.mrf.mxu1  ;;  %v1886_v49 = vpack.c.bf16 %v1784_v56, %v1783_v3 }
 0x2ad   : > { %v1655_v54 = vadd.f32 %v1654_v63, %v1566_v43  ;;  %v4719_v63 = vld [vmem:[#allocation8_spill] sm:$0xff] }
 0x2af   : > { %2307 = vmatmul.bf16.gmra.mxu1 %v1876_v61  ;;  %v4409_v33 = vadd.f32 %v1743_v62, %v1655_v54  ;;  %v4423_v62 = vpop.f32.mrf.mxu0  ;;  %v1841_v61 = vld [vmem:[#allocation2 + $0x92] sm:$0xff] }
 0x2b0   : > { %v1349_v22 = vpop.f32.mrf.mxu3 }
 0x2b1   : > { %v4415_v59 = vadd.f32 %v1349_v22, %v4716_v10  ;;  %v1842_v22 = vld [vmem:[#allocation2 + $0x9a] sm:$0xff]  ;;  %v1571_v10 = vadd.f32 %v4259_v19, %v4359_v34 }
 0x2b2   : > { %v4417_v13 = vpop.f32.mrf.mxu2  ;;  %v1879_v56 = vpack.c.bf16 %v1842_v22, %v1841_v61  ;;  %v1829_v61 = vld [vmem:[#allocation2 + $0x181] sm:$0xff]  ;;  %v1830_v22 = vld [vmem:[#allocation2 + $0x189] sm:$0xff] }
 0x2b3   : > { %4717 = vst [vmem:[#allocation3_spill] sm:$0xff] %v4417_v13  ;;  %v1785_v13 = vld [vmem:[#allocation2 + $0xf0] sm:$0xff] }
 0x2b4   : > { %v1656_v36 = vpop.f32.mrf.mxu1 }
 0x2b5   : > { %v4421_v15 = vadd.f32 %v1656_v36, %v1568_v31  ;;  %2149 = vmatmul.bf16.gmra.mxu3 %v1886_v49  ;;  %v1786_v49 = vld [vmem:[#allocation2 + $0xf8] sm:$0xff] }
 0x2b6   : > { %v1889_v19 = vpack.c.bf16 %v1786_v49, %v1785_v13 }
 0x2b7   : > { %4718 = vst [vmem:[#allocation4_spill] sm:$0xff] %v4421_v15  ;;  %v4433_v36 = vpop.f32.mrf.mxu0 }
 0x2b8   : > { %v1352_v43 = vpop.f32.mrf.mxu3 }
 0x2b9   : > { %v4426_v54 = vadd.f32 %v1352_v43, %v4719_v63  ;;  %v4720_v43 = vld [vmem:[#allocation9_spill] sm:$0xff] }
 0x2ba   : > { %v1748_v5 = vpop.f32.mrf.mxu2 }
 0x2bb   : > { %2268 = vmatmul.bf16.gmra.mxu0 %v4318_v9  ;;  %v1573_v9 = vadd.f32 %v4280_v28, %v4372_v17 }
 0x2bc   : > { %v1659_v48 = vpop.f32.mrf.mxu1 }
 0x2bd   : > { %v1660_v45 = vadd.f32 %v1659_v48, %v1571_v10  ;;  %v1908_v48 = vpack.c.bf16 %v1830_v22, %v1829_v61  ;;  %v1787_v61 = vld [vmem:[#allocation2 + $0x108] sm:$0xff] }
 0x2bf   : > { %2312 = vmatmul.bf16.gmra.mxu1 %v1879_v56  ;;  %v4431_v3 = vadd.f32 %v1748_v5, %v1660_v45  ;;  %v1843_v45 = vld [vmem:[#allocation2 + $0xaa] sm:$0xff]  ;;  %v1844_v56 = vld [vmem:[#allocation2 + $0xb2] sm:$0xff] }
 0x2c0   : > { %v1354_v31 = vpop.f32.mrf.mxu3  ;;  %v1882_v13 = vpack.c.bf16 %v1844_v56, %v1843_v45  ;;  %v1845_v56 = vld [vmem:[#allocation2 + $0xc2] sm:$0xff] }
 0x2c1   : > { %v4436_v63 = vadd.f32 %v1354_v31, %v4720_v43  ;;  %v4446_v43 = vpop.f32.mrf.mxu0 }
 0x2c2   : > { %v4438_v15 = vpop.f32.mrf.mxu2 }
 0x2c3   : > { %4721 = vst [vmem:[#allocation5_spill] sm:$0xff] %v4438_v15  ;;  %v1576_v15 = vadd.f32 %v4293_v42, %v4383_v2 }
 0x2c4   : > { %v1661_v34 = vpop.f32.mrf.mxu1 }
 0x2c5   : > { %v4442_v10 = vadd.f32 %v1661_v34, %v1573_v9  ;;  %2154 = vmatmul.bf16.gmra.mxu3 %v1889_v19  ;;  %v3334_v9 = vld [vmem:[%s4702_s5] sm:$0xff]  ;;  %v1788_v34 = vld [vmem:[#allocation2 + $0x110] sm:$0xff] }
 0x2c6   : > { %2560 = vmatpush.bf16.msra.mxu2 %v3334_v9  ;;  %v1892_v42 = vpack.c.bf16 %v1788_v34, %v1787_v61  ;;  %v1789_v34 = vld [vmem:[#allocation2 + $0x120] sm:$0xff]  ;;  %v1583_v61 = vadd.f32 %v4340_v26, %v4415_v59 }
 0x2c8   : > { %v4444_v5 = vpop.f32.mrf.mxu3 }
 0x2ca   : > { %v1753_v31 = vpop.f32.mrf.mxu2 }
 0x2cb   : > { %2273 = vmatmul.bf16.gmra.mxu0 %v1908_v48  ;;  %v1578_v48 = vadd.f32 %v4309_v53, %v4391_v20  ;;  %v1790_v20 = vld [vmem:[#allocation2 + $0x128] sm:$0xff] }
 0x2cc   : > { %v1664_v28 = vpop.f32.mrf.mxu1 }
 0x2cd   : > { %v1665_v17 = vadd.f32 %v1664_v28, %v1576_v15 }
 0x2cf   : > { %2317 = vmatmul.bf16.gmra.mxu1 %v1882_v13  ;;  %v4450_v49 = vadd.f32 %v1753_v31, %v1665_v17  ;;  %v1846_v31 = vld [vmem:[#allocation2 + $0xca] sm:$0xff]  ;;  %v1581_v17 = vadd.f32 %v4326_v1, %v4402_v21  ;;  %v1847_v21 = vld [vmem:[#allocation2 + $0xda] sm:$0xff] }
 0x2d0   : > { %v2117_v19 = vpop.f32.mrf.mxu3 }
 0x2d1   : > { %4722 = vst [vmem:[#allocation6_spill] sm:$0xff] %v4450_v49  ;;  %v1885_v49 = vpack.c.bf16 %v1846_v31, %v1845_v56  ;;  %v1586_v56 = vadd.f32 %v4354_v47, %v4426_v54  ;;  %v4487_v47 = vpop.f32.mrf.mxu0 }
 0x2d2   : > { %v4455_v22 = vpop.f32.mrf.mxu2 }
 0x2d3   : > { %4723 = vst [vmem:[#allocation7_spill] sm:$0xff] %v4455_v22 }
 0x2d4   : > { %v1666_v2 = vpop.f32.mrf.mxu1 }
 0x2d5   : > { %v4459_v15 = vadd.f32 %v1666_v2, %v1578_v48  ;;  %2159 = vmatmul.bf16.gmra.mxu3 %v1892_v42  ;;  %v1895_v48 = vpack.c.bf16 %v1790_v20, %v1789_v34  ;;  %v1792_v20 = vld [vmem:[#allocation2 + $0x140] sm:$0xff]  ;;  %v1588_v34 = vadd.f32 %v4364_v25, %v4436_v63  ;;  %v1794_v25 = vld [vmem:[#allocation2 + $0x158] sm:$0xff] }
 0x2d7   : > { %4724 = vst [vmem:[#allocation8_spill] sm:$0xff] %v4459_v15 }
 0x2d8   : > { %v4461_v45 = vpop.f32.mrf.mxu3 }
 0x2d9   : > { %v4493_v63 = vpop.f32.mrf.mxu0 }
 0x2da   : > { %v1758_v28 = vpop.f32.mrf.mxu2 }
 0x2dc   : > { %v1669_v13 = vpop.f32.mrf.mxu1 }
 0x2dd   : > { %v1670_v9 = vadd.f32 %v1669_v13, %v1581_v17 }
 0x2df   : > { %2322 = vmatmul.bf16.gmra.mxu1 %v1885_v49  ;;  %v4465_v22 = vadd.f32 %v1758_v28, %v1670_v9  ;;  %v1848_v49 = vld [vmem:[#allocation2 + $0xe2] sm:$0xff]  ;;  %v1791_v9 = vld [vmem:[#allocation2 + $0x138] sm:$0xff] }
 0x2e0   : > { %v4467_v53 = vpop.f32.mrf.mxu3  ;;  %v1888_v17 = vpack.c.bf16 %v1848_v49, %v1847_v21  ;;  %v1849_v21 = vld [vmem:[#allocation2 + $0xf2] sm:$0xff]  ;;  %v1850_v49 = vld [vmem:[#allocation2 + $0xfa] sm:$0xff] }
 0x2e2   : > { %v4471_v2 = vpop.f32.mrf.mxu2 }
 0x2e3   : > { %4725 = vst [vmem:[#allocation9_spill] sm:$0xff] %v4471_v2 }
 0x2e4   : > { %v1671_v42 = vpop.f32.mrf.mxu1 }
 0x2e5   : > { %v4473_v15 = vadd.f32 %v1671_v42, %v1583_v61  ;;  %2164 = vmatmul.bf16.gmra.mxu3 %v1895_v48  ;;  %v1898_v61 = vpack.c.bf16 %v1792_v20, %v1791_v9  ;;  %v2207_v20 = vadd.f32 %v4395_v24, %v2117_v19  ;;  %v4507_v24 = vpop.f32.mrf.mxu0 }
 0x2e7   : > { %4726 = vst [vmem:[#allocation11_spill] sm:$0xff] %v4473_v15 }
 0x2e8   : > { %v4475_v1 = vpop.f32.mrf.mxu3 }
 0x2ea   : > { %v1763_v13 = vpop.f32.mrf.mxu2 }
 0x2ec   : > { %v1674_v31 = vpop.f32.mrf.mxu1 }
 0x2ed   : > { %v1675_v28 = vadd.f32 %v1674_v31, %v1586_v56  ;;  %v2205_v31 = vadd.f32 %v4380_v44, %v4444_v5 }
 0x2ef   : > { %2327 = vmatmul.bf16.gmra.mxu1 %v1888_v17  ;;  %v4479_v26 = vadd.f32 %v1763_v13, %v1675_v28  ;;  %v1891_v28 = vpack.c.bf16 %v1850_v49, %v1849_v21  ;;  %v1793_v13 = vld [vmem:[#allocation2 + $0x150] sm:$0xff] }
 0x2f0   : > { %v4481_v59 = vpop.f32.mrf.mxu3 }
 0x2f1   : > { %4727 = vst [vmem:[#allocation12_spill] sm:$0xff] %v4479_v26 }
 0x2f4   : > { %v1676_v48 = vpop.f32.mrf.mxu1 }
 0x2f5   : > { %v4485_v42 = vadd.f32 %v1676_v48, %v1588_v34  ;;  %2169 = vmatmul.bf16.gmra.mxu3 %v1898_v61  ;;  %v4729_v34 = vld [vmem:[#allocation10_spill] sm:$0xff]  ;;  %v4502_v48 = vld [vmem:[%s4701_s4] ss:$0 sm:$0xff] }
 0x2f7   : > { %4728 = vst [vmem:[#allocation13_spill] sm:$0xff] %v4485_v42  ;;  %v1901_v42 = vpack.c.bf16 %v1794_v25, %v1793_v13  ;;  %v2210_v13 = vadd.f32 %v4407_v4, %v4461_v45 }
 0x2f8   : > { %v4489_v54 = vpop.f32.mrf.mxu3 }
 0x2fc   : > { %v2293_v56 = vpop.f32.mrf.mxu1 }
 0x2fd   : > { %v2294_v17 = vadd.f32 %v2293_v56, %v2205_v31  ;;  %v1851_v31 = vld [vmem:[#allocation2 + $0x10a] sm:$0xff] }
 0x2ff   : > { %2332 = vmatmul.bf16.gmra.mxu1 %v1891_v28  ;;  %v2373_v61 = vadd.f32 %v2294_v17, %v4729_v34  ;;  %v1852_v28 = vld [vmem:[#allocation2 + $0x112] sm:$0xff] }
 0x300   : > { %v4495_v9 = vpop.f32.mrf.mxu3 }
 0x301   : > { %v2409_v21 = vadd.f32 %v4502_v48, %v2373_v61  ;;  %v1796_v61 = vld [vmem:[#allocation2 + $0x170] sm:$0xff] }
 0x303   : > { %v2441_v19 = vmax.f32 %v2409_v21, 0.0 }
 0x304   : > { %v2295_v44 = vpop.f32.mrf.mxu1 }
 0x305   : > { %v2296_v5 = vadd.f32 %v2295_v44, %v2207_v20  ;;  %2174 = vmatmul.bf16.gmra.mxu3 %v1901_v42  ;;  %v1894_v42 = vpack.c.bf16 %v1852_v28, %v1851_v31  ;;  %v2212_v44 = vadd.f32 %v4423_v62, %v4467_v53  ;;  %v1853_v31 = vld [vmem:[#allocation2 + $0x122] sm:$0xff]  ;;  %v1854_v28 = vld [vmem:[#allocation2 + $0x12a] sm:$0xff] }
 0x307   : > { %v2374_v49 = vadd.f32 %v2296_v5, %v4142_v23  ;;  %v1795_v23 = vld [vmem:[#allocation2 + $0x168] sm:$0xff] }
 0x308   : > { %v4509_v34 = vpop.f32.mrf.mxu3  ;;  %v1904_v21 = vpack.c.bf16 %v1796_v61, %v1795_v23  ;;  %v2217_v23 = vadd.f32 %v4446_v43, %v4481_v59 }
 0x309   : > { %v2410_v56 = vadd.f32 %v4502_v48, %v2374_v49 }
 0x30b   : > { %v2442_v17 = vmax.f32 %v2410_v56, 0.0  ;;  %v4516_v56 = vpop.f32.mrf.mxu0 }
 0x30c   : > { %v2298_v26 = vpop.f32.mrf.mxu1 }
 0x30d   : > { %v2473_v25 = vpack.c.bf16 %v2442_v17, %v2441_v19  ;;  %v2299_v20 = vadd.f32 %v2298_v26, %v2210_v13  ;;  %v1897_v17 = vpack.c.bf16 %v1854_v28, %v1853_v31  ;;  %v1856_v31 = vld [vmem:[#allocation2 + $0x142] sm:$0xff] }
 0x30f   : > { %2337 = vmatmul.bf16.gmra.mxu1 %v1894_v42  ;;  %2561 = vmatmul.bf16.vlgmr.msra.gmra.mxu2 %v2473_v25  ;;  %v2375_v5 = vadd.f32 %v2299_v20, %v4156_v55  ;;  %v2215_v55 = vadd.f32 %v4433_v36, %v4475_v1 }
 0x310   : > { %v4518_v15 = vpop.f32.mrf.mxu3 }
 0x311   : > { %v2411_v4 = vadd.f32 %v4502_v48, %v2375_v5 }
 0x313   : > { %v2443_v19 = vmax.f32 %v2411_v4, 0.0  ;;  %v4525_v25 = vpop.f32.mrf.mxu0 }
 0x314   : > { %v2300_v49 = vpop.f32.mrf.mxu1 }
 0x315   : > { %v2301_v2 = vadd.f32 %v2300_v49, %v2212_v44  ;;  %2179 = vmatmul.bf16.gmra.mxu3 %v1904_v21 }
 0x317   : > { %v2376_v45 = vadd.f32 %v2301_v2, %v4174_v40  ;;  %v1797_v40 = vld [vmem:[#allocation2 + $0x180] sm:$0xff]  ;;  %v1798_v2 = vld [vmem:[#allocation2 + $0x188] sm:$0xff] }
 0x318   : > { %v4527_v20 = vpop.f32.mrf.mxu3  ;;  %v1907_v44 = vpack.c.bf16 %v1798_v2, %v1797_v40 }
 0x319   : > { %v2412_v26 = vadd.f32 %v4502_v48, %v2376_v45 }
 0x31b   : > { %v2444_v62 = vmax.f32 %v2412_v26, 0.0  ;;  %v4534_v49 = vpop.f32.mrf.mxu0  ;;  %v1855_v26 = vld [vmem:[#allocation2 + $0x13a] sm:$0xff] }
 0x31c   : > { %v2303_v53 = vpop.f32.mrf.mxu1 }
 0x31d   : > { %v2474_v13 = vpack.c.bf16 %v2444_v62, %v2443_v19  ;;  %v2304_v42 = vadd.f32 %v2303_v53, %v2215_v55  ;;  %v1900_v19 = vpack.c.bf16 %v1856_v31, %v1855_v26  ;;  %v2222_v55 = vadd.f32 %v4493_v63, %v4495_v9  ;;  %v3377_v26 = vld [vmem:[#allocation2] sm:$0xff] }
 0x31e   : > { %v2225_v63 = vadd.f32 %v4507_v24, %v4509_v34  ;;  %v1910_v31 = vpack.c.bf16 %v3377_v26, %v3377_v26  ;;  %v1831_v24 = vld [vmem:[#allocation2 + $0x199] sm:$0xff]  ;;  %v1832_v34 = vld [vmem:[#allocation2 + $0x1a1] sm:$0xff]  ;;  %v1862_v26 = vld [vmem:[#allocation2 + $0x18a] sm:$0xff] }
 0x31f   : > { %2342 = vmatmul.bf16.gmra.mxu1 %v1897_v17  ;;  %2566 = vmatmul.bf16.gmra.mxu2 %v2474_v13  ;;  %v2377_v61 = vadd.f32 %v2304_v42, %v4186_v18  ;;  %v2220_v18 = vadd.f32 %v4487_v47, %v4489_v54 }
 0x320   : > { %v4537_v45 = vpop.f32.mrf.mxu3 }
 0x321   : > { %v2413_v36 = vadd.f32 %v4502_v48, %v2377_v61  ;;  %v1858_v61 = vld [vmem:[#allocation2 + $0x15a] sm:$0xff] }
 0x323   : > { %v2445_v28 = vmax.f32 %v2413_v36, 0.0 }
 0x324   : > { %v2305_v5 = vpop.f32.mrf.mxu1 }
 0x325   : > { %v2306_v21 = vadd.f32 %v2305_v5, %v2217_v23  ;;  %2184 = vmatmul.bf16.gmra.mxu3 %v1907_v44  ;;  %v1857_v23 = vld [vmem:[#allocation2 + $0x152] sm:$0xff] }
 0x327   : > { %v2378_v1 = vadd.f32 %v2306_v21, %v4204_v39  ;;  %v4541_v39 = vpop.f32.mrf.mxu0 }
 0x328   : > { %v4546_v13 = vpop.f32.mrf.mxu3 }
 0x329   : > { %v2414_v4 = vadd.f32 %v4502_v48, %v2378_v1 }
 0x32b   : > { %v2446_v43 = vmax.f32 %v2414_v4, 0.0 }
 0x32c   : > { %v2308_v59 = vpop.f32.mrf.mxu1 }
 0x32d   : > { %v2475_v62 = vpack.c.bf16 %v2446_v43, %v2445_v28  ;;  %v2309_v53 = vadd.f32 %v2308_v59, %v2220_v18  ;;  %v1711_v59 = vadd.f32 %v4252_v0, %v4256_v58  ;;  %v2230_v0 = vadd.f32 %v4525_v25, %v4527_v20 }
 0x32f   : > { %2347 = vmatmul.bf16.gmra.mxu1 %v1900_v19  ;;  %2571 = vmatmul.bf16.gmra.mxu2 %v2475_v62  ;;  %v2379_v17 = vadd.f32 %v2309_v53, %v4218_v37  ;;  %v2236_v36 = vpop.f32.mrf.mxu0  ;;  %v1903_v37 = vpack.c.bf16 %v1858_v61, %v1857_v23 }
 0x330   : > { %v2147_v1 = vpop.f32.mrf.mxu3 }
 0x331   : > { %v2415_v2 = vadd.f32 %v4502_v48, %v2379_v17 }
 0x333   : > { %v2447_v44 = vmax.f32 %v2415_v2, 0.0 }
 0x334   : > { %v2310_v42 = vpop.f32.mrf.mxu1 }
 0x335   : > { %v2311_v40 = vadd.f32 %v2310_v42, %v2222_v55  ;;  %2189 = vmatmul.bf16.gmra.mxu3 %v1910_v31  ;;  %v1911_v55 = vpack.c.bf16 %v1832_v34, %v1831_v24  ;;  %v1721_v34 = vadd.f32 %v4303_v35, %v4307_v50 }
 0x337   : > { %v2380_v47 = vadd.f32 %v2311_v40, %v4230_v60  ;;  %v2227_v60 = vadd.f32 %v4516_v56, %v4518_v15  ;;  %v2239_v19 = vpop.f32.mrf.mxu0  ;;  %2278 = vmatmul.bf16.gmra.mxu0 %v1911_v55  ;;  %v1859_v15 = vld [vmem:[#allocation2 + $0x16a] sm:$0xff]  ;;  %v1860_v56 = vld [vmem:[#allocation2 + $0x172] sm:$0xff] }
 0x338   : > { %v2150_v17 = vpop.f32.mrf.mxu3  ;;  %v1906_v58 = vpack.c.bf16 %v1860_v56, %v1859_v15  ;;  %v1863_v56 = vld [vmem:[#allocation2 + $0x19a] sm:$0xff] }
 0x339   : > { %v2416_v54 = vadd.f32 %v4502_v48, %v2380_v47 }
 0x33b   : > { %v2448_v5 = vmax.f32 %v2416_v54, 0.0 }
 0x33c   : > { %v2313_v21 = vpop.f32.mrf.mxu1 }
 0x33d   : > { %v2476_v9 = vpack.c.bf16 %v2448_v5, %v2447_v44  ;;  %v2314_v4 = vadd.f32 %v2313_v21, %v2225_v63  ;;  %v2232_v44 = vadd.f32 %v4534_v49, %v4537_v45  ;;  %v1716_v63 = vadd.f32 %v4278_v46, %v4284_v11 }
 0x33e   : > { %v2237_v46 = vadd.f32 %v2236_v36, %v2147_v1  ;;  %v2240_v1 = vadd.f32 %v2239_v19, %v2150_v17 }
 0x33f   : > { %2352 = vmatmul.bf16.gmra.mxu1 %v1903_v37  ;;  %2576 = vmatmul.bf16.gmra.mxu2 %v2476_v9  ;;  %v2381_v28 = vadd.f32 %v2314_v4, %v4244_v51  ;;  %v2241_v23 = vpop.f32.mrf.mxu0  ;;  %v1861_v4 = vld [vmem:[#allocation2 + $0x182] sm:$0xff] }
 0x340   : > { %v2152_v61 = vpop.f32.mrf.mxu3  ;;  %v1909_v49 = vpack.c.bf16 %v1862_v26, %v1861_v4 }
 0x341   : > { %v2417_v62 = vadd.f32 %v4502_v48, %v2381_v28  ;;  %v2242_v50 = vadd.f32 %v2241_v23, %v2152_v61 }
 0x343   : > { %v2449_v51 = vmax.f32 %v2417_v62, 0.0 }
 0x344   : > { %v2315_v43 = vpop.f32.mrf.mxu1 }
 0x345   : > { %v2316_v18 = vadd.f32 %v2315_v43, %v2227_v60 }
 0x347   : > { %v2382_v53 = vadd.f32 %v2316_v18, %v1711_v59  ;;  %v2244_v31 = vpop.f32.mrf.mxu0 }
 0x348   : > { %v2155_v43 = vpop.f32.mrf.mxu3 }
 0x349   : > { %v2418_v42 = vadd.f32 %v4502_v48, %v2382_v53  ;;  %v2245_v4 = vadd.f32 %v2244_v31, %v2155_v43  ;;  %v4586_v31 = vpop.f32.mrf.mxu2 }
 0x34b   : > { %v2450_v40 = vmax.f32 %v2418_v42, 0.0 }
 0x34c   : > { %v2318_v2 = vpop.f32.mrf.mxu1 }
 0x34d   : > { %v2477_v47 = vpack.c.bf16 %v2450_v40, %v2449_v51  ;;  %v2319_v54 = vadd.f32 %v2318_v2, %v2230_v0 }
 0x34f   : > { %2357 = vmatmul.bf16.gmra.mxu1 %v1906_v58  ;;  %2581 = vmatmul.bf16.gmra.mxu2 %v2477_v47  ;;  %v2383_v5 = vadd.f32 %v2319_v54, %v4270_v38  ;;  %v2235_v38 = vadd.f32 %v4541_v39, %v4546_v13  ;;  %v2246_v62 = vpop.f32.mrf.mxu0  ;;  %v1864_v39 = vld [vmem:[#allocation2 + $0x1a2] sm:$0xff] }
 0x350   : > { %v2157_v55 = vpop.f32.mrf.mxu3  ;;  %v1912_v2 = vpack.c.bf16 %v1864_v39, %v1863_v56  ;;  %v1736_v56 = vadd.f32 %v4374_v12, %v4378_v57 }
 0x351   : > { %v2419_v9 = vadd.f32 %v4502_v48, %v2383_v5  ;;  %v2247_v61 = vadd.f32 %v2246_v62, %v2157_v55  ;;  %v3378_v55 = vld [vmem:[%s3492_s16] sm:$0xff] }
 0x353   : > { %v2451_v60 = vmax.f32 %v2419_v9, 0.0 }
 0x354   : > { %v2320_v21 = vpop.f32.mrf.mxu1 }
 0x355   : > { %v2321_v37 = vadd.f32 %v2320_v21, %v2232_v44  ;;  %v1726_v44 = vadd.f32 %v4331_v14, %v4335_v52 }
 0x357   : > { %v2384_v25 = vadd.f32 %v2321_v37, %v1716_v63  ;;  %v2249_v0 = vpop.f32.mrf.mxu0 }
 0x358   : > { %v2160_v35 = vpop.f32.mrf.mxu3 }
 0x359   : > { %v2420_v20 = vadd.f32 %v4502_v48, %v2384_v25 }
 0x35b   : > { %v2452_v28 = vmax.f32 %v2420_v20, 0.0 }
 0x35c   : > { %v2323_v59 = vpop.f32.mrf.mxu1 }
 0x35d   : > { %v2478_v45 = vpack.c.bf16 %v2452_v28, %v2451_v60  ;;  %v2324_v18 = vadd.f32 %v2323_v59, %v2235_v38  ;;  %v1731_v28 = vadd.f32 %v4350_v8, %v4356_v6 }
 0x35f   : > { %2362 = vmatmul.bf16.gmra.mxu1 %v1909_v49  ;;  %2586 = vmatmul.bf16.gmra.mxu2 %v2478_v45  ;;  %v2385_v11 = vadd.f32 %v2324_v18, %v4298_v16  ;;  %v2251_v37 = vpop.f32.mrf.mxu0 }
 0x360   : > { %v2162_v17 = vpop.f32.mrf.mxu3 }
 0x361   : > { %v2421_v42 = vadd.f32 %v4502_v48, %v2385_v11  ;;  %v2252_v6 = vadd.f32 %v2251_v37, %v2162_v17 }
 0x363   : > { %v2453_v51 = vmax.f32 %v2421_v42, 0.0 }
 0x364   : > { %v2325_v24 = vpop.f32.mrf.mxu1 }
 0x365   : > { %v2326_v53 = vadd.f32 %v2325_v24, %v2237_v46 }
 0x367   : > { %v2386_v15 = vadd.f32 %v2326_v53, %v1721_v34 }
 0x368   : > { %v2165_v14 = vpop.f32.mrf.mxu3 }
 0x369   : > { %v2422_v13 = vadd.f32 %v4502_v48, %v2386_v15 }
 0x36b   : > { %v2454_v40 = vmax.f32 %v2422_v13, 0.0 }
 0x36c   : > { %v2328_v36 = vpop.f32.mrf.mxu1 }
 0x36d   : > { %v2479_v16 = vpack.c.bf16 %v2454_v40, %v2453_v51  ;;  %v2329_v58 = vadd.f32 %v2328_v36, %v2240_v1 }
 0x36f   : > { %2367 = vmatmul.bf16.gmra.mxu1 %v1912_v2  ;;  %2591 = vmatmul.bf16.gmra.mxu2 %v2479_v16  ;;  %v2387_v47 = vadd.f32 %v2329_v58, %v4321_v30  ;;  %v2254_v30 = vpop.f32.mrf.mxu0  ;;  %v3379_v58 = vld [vmem:[%s3492_s16 + $0x8] sm:$0xff] }
 0x370   : > { %v2167_v34 = vpop.f32.mrf.mxu3 }
 0x371   : > { %v2423_v21 = vadd.f32 %v4502_v48, %v2387_v47  ;;  %v2255_v47 = vadd.f32 %v2254_v30, %v2165_v14 }
 0x373   : > { %v2455_v9 = vmax.f32 %v2423_v21, 0.0 }
 0x374   : > { %v2330_v54 = vpop.f32.mrf.mxu1 }
 0x375   : > { %v2331_v5 = vadd.f32 %v2330_v54, %v2242_v50 }
 0x377   : > { %v2388_v63 = vadd.f32 %v2331_v5, %v1726_v44  ;;  %v2256_v11 = vpop.f32.mrf.mxu0 }
 0x378   : > { %v2170_v2 = vpop.f32.mrf.mxu3 }
 0x379   : > { %v2424_v19 = vadd.f32 %v4502_v48, %v2388_v63  ;;  %v2257_v63 = vadd.f32 %v2256_v11, %v2167_v34  ;;  %v3382_v11 = vld [vmem:[%s3492_s16 + $0x20] sm:$0xff]  ;;  %v4730_v34 = vld [vmem:[#allocation4_spill] sm:$0xff] }
 0x37b   : > { %v2456_v25 = vmax.f32 %v2424_v19, 0.0  ;;  %v3380_v19 = vld [vmem:[%s3492_s16 + $0x10] sm:$0xff] }
 0x37c   : > { %v2333_v20 = vpop.f32.mrf.mxu1 }
 0x37d   : > { %v2480_v26 = vpack.c.bf16 %v2456_v25, %v2455_v9  ;;  %v2334_v23 = vadd.f32 %v2333_v20, %v2245_v4  ;;  %v1741_v25 = vadd.f32 %v4393_v41, %v4399_v7 }
 0x37f   : > { %2596 = vmatmul.bf16.gmra.mxu2 %v2480_v26  ;;  %v2389_v60 = vadd.f32 %v2334_v23, %v4345_v29  ;;  %v2250_v29 = vadd.f32 %v2249_v0, %v2160_v35  ;;  %v2259_v51 = vpop.f32.mrf.mxu0 }
 0x380   : > { %v2172_v5 = vpop.f32.mrf.mxu3 }
 0x381   : > { %v2425_v38 = vadd.f32 %v4502_v48, %v2389_v60 }
 0x383   : > { %v2457_v43 = vmax.f32 %v2425_v38, 0.0 }
 0x384   : > { %v2335_v52 = vpop.f32.mrf.mxu1 }
 0x385   : > { %v2336_v59 = vadd.f32 %v2335_v52, %v2247_v61  ;;  %v3381_v52 = vld [vmem:[%s3492_s16 + $0x18] sm:$0xff] }
 0x387   : > { %v2390_v49 = vadd.f32 %v2336_v59, %v1731_v28  ;;  %v2261_v44 = vpop.f32.mrf.mxu0 }
 0x388   : > { %v2175_v59 = vpop.f32.mrf.mxu3 }
 0x389   : > { %v2426_v45 = vadd.f32 %v4502_v48, %v2390_v49  ;;  %v2260_v49 = vadd.f32 %v2259_v51, %v2170_v2 }
 0x38b   : > { %v2458_v18 = vmax.f32 %v2426_v45, 0.0 }
 0x38c   : > { %v2338_v46 = vpop.f32.mrf.mxu1 }
 0x38d   : > { %v2481_v24 = vpack.c.bf16 %v2458_v18, %v2457_v43  ;;  %v2339_v62 = vadd.f32 %v2338_v46, %v2250_v29  ;;  %v2262_v18 = vadd.f32 %v2261_v44, %v2172_v5  ;;  %v4732_v5 = vld [vmem:[#allocation5_spill] sm:$0xff] }
 0x38f   : > { %2601 = vmatmul.bf16.gmra.mxu2 %v2481_v24  ;;  %v2391_v53 = vadd.f32 %v2339_v62, %v4366_v32  ;;  %v2264_v60 = vpop.f32.mrf.mxu0  ;;  %v4731_v62 = vld [vmem:[#allocation3_spill] sm:$0xff] }
 0x391   : > { %v2427_v32 = vadd.f32 %v4502_v48, %v2391_v53 }
 0x392   : > { %v2562_v8 = vpop.f32.mrf.mxu2 }
 0x393   : > { %v2642_v42 = vadd.f32 %v3378_v55, %v2562_v8  ;;  %v2459_v16 = vmax.f32 %v2427_v32, 0.0  ;;  %v1746_v8 = vadd.f32 %v4731_v62, %v4730_v34  ;;  %v3383_v32 = vld [vmem:[%s3492_s16 + $0x28] sm:$0xff] }
 0x394   : > { %v2340_v15 = vpop.f32.mrf.mxu1 }
 0x395   : > { %v2674_v39 = vmax.f32 %v2642_v42, 0.0  ;;  %v2341_v13 = vadd.f32 %v2340_v15, %v2252_v6  ;;  %v2177_v42 = vpop.f32.mrf.mxu3 }
 0x397   : > { %2706 = vst [vmem:[%s4595_s27] sm:$0xff] %v2674_v39  ;;  %v2392_v40 = vadd.f32 %v2341_v13, %v1736_v56  ;;  %v2266_v6 = vpop.f32.mrf.mxu0 }
 0x399   : > { %v2428_v36 = vadd.f32 %v4502_v48, %v2392_v40 }
 0x39a   : > { %v2564_v1 = vpop.f32.mrf.mxu2 }
 0x39b   : > { %v2460_v0 = vmax.f32 %v2428_v36, 0.0  ;;  %v2643_v35 = vadd.f32 %v3379_v58, %v2564_v1  ;;  %v2265_v36 = vadd.f32 %v2264_v60, %v2175_v59 }
 0x39c   : > { %v2343_v50 = vpop.f32.mrf.mxu1 }
 0x39d   : > { %v2675_v12 = vmax.f32 %v2643_v35, 0.0  ;;  %v2482_v57 = vpack.c.bf16 %v2460_v0, %v2459_v16  ;;  %v2344_v54 = vadd.f32 %v2343_v50, %v2255_v47  ;;  %v2180_v35 = vpop.f32.mrf.mxu3  ;;  %v2267_v47 = vadd.f32 %v2266_v6, %v2177_v42  ;;  %v3387_v42 = vld [vmem:[%s3492_s16 + $0x48] sm:$0xff] }
 0x39f   : > { %2707 = vst [vmem:[%s4595_s27 + $0x8] sm:$0xff] %v2675_v12  ;;  %2606 = vmatmul.bf16.gmra.mxu2 %v2482_v57  ;;  %v2393_v37 = vadd.f32 %v2344_v54, %v4388_v27  ;;  %v2269_v0 = vpop.f32.mrf.mxu0  ;;  %v3384_v57 = vld [vmem:[%s3492_s16 + $0x30] sm:$0xff] }
 0x3a0   : > { %v2270_v60 = vadd.f32 %v2269_v0, %v2180_v35  ;;  %v4736_v35 = vld [vmem:[#allocation11_spill] sm:$0xff] }
 0x3a1   : > { %v2429_v26 = vadd.f32 %v4502_v48, %v2393_v37 }
 0x3a2   : > { %v2567_v21 = vpop.f32.mrf.mxu2 }
 0x3a3   : > { %v2644_v17 = vadd.f32 %v3380_v19, %v2567_v21  ;;  %v2461_v14 = vmax.f32 %v2429_v26, 0.0  ;;  %v1751_v21 = vadd.f32 %v4732_v5, %v4442_v10 }
 0x3a4   : > { %v2345_v9 = vpop.f32.mrf.mxu1 }
 0x3a5   : > { %v2676_v20 = vmax.f32 %v2644_v17, 0.0  ;;  %v2346_v4 = vadd.f32 %v2345_v9, %v2257_v63 }
 0x3a7   : > { %2708 = vst [vmem:[%s4595_s27 + $0x10] sm:$0xff] %v2676_v20  ;;  %v2394_v23 = vadd.f32 %v2346_v4, %v1741_v25  ;;  %v2271_v9 = vpop.f32.mrf.mxu0  ;;  %v2182_v20 = vpop.f32.mrf.mxu3 }
 0x3a8   : > { %v2272_v59 = vadd.f32 %v2271_v9, %v2182_v20  ;;  %v3389_v9 = vld [vmem:[%s3492_s16 + $0x58] sm:$0xff] }
 0x3a9   : > { %v2430_v30 = vadd.f32 %v4502_v48, %v2394_v23  ;;  %v3385_v23 = vld [vmem:[%s3492_s16 + $0x38] sm:$0xff] }
 0x3aa   : > { %v2569_v61 = vpop.f32.mrf.mxu2 }
 0x3ab   : > { %v2462_v27 = vmax.f32 %v2430_v30, 0.0  ;;  %v2645_v28 = vadd.f32 %v3381_v52, %v2569_v61 }
 0x3ac   : > { %v2348_v38 = vpop.f32.mrf.mxu1 }
 0x3ad   : > { %v2677_v41 = vmax.f32 %v2645_v28, 0.0  ;;  %v2483_v7 = vpack.c.bf16 %v2462_v27, %v2461_v14  ;;  %v2349_v45 = vadd.f32 %v2348_v38, %v2260_v49  ;;  %v4733_v38 = vld [vmem:[#allocation6_spill] sm:$0xff] }
 0x3af   : > { %2709 = vst [vmem:[%s4595_s27 + $0x18] sm:$0xff] %v2677_v41  ;;  %2611 = vmatmul.bf16.gmra.mxu2 %v2483_v7  ;;  %v2395_v46 = vadd.f32 %v2349_v45, %v4409_v33  ;;  %v2274_v28 = vpop.f32.mrf.mxu0  ;;  %v3386_v41 = vld [vmem:[%s3492_s16 + $0x40] sm:$0xff]  ;;  %v2185_v45 = vpop.f32.mrf.mxu3 }
 0x3b1   : > { %v2431_v15 = vadd.f32 %v4502_v48, %v2395_v46  ;;  %v4735_v46 = vld [vmem:[#allocation7_spill] sm:$0xff] }
 0x3b2   : > { %v2572_v43 = vpop.f32.mrf.mxu2 }
 0x3b3   : > { %v2646_v29 = vadd.f32 %v3382_v11, %v2572_v43  ;;  %v2463_v33 = vmax.f32 %v2431_v15, 0.0 }
 0x3b4   : > { %v2350_v24 = vpop.f32.mrf.mxu1 }
 0x3b5   : > { %v2678_v53 = vmax.f32 %v2646_v29, 0.0  ;;  %v2351_v55 = vadd.f32 %v2350_v24, %v2262_v18  ;;  %v4734_v18 = vld [vmem:[#allocation8_spill] sm:$0xff] }
 0x3b6   : > { %v1756_v11 = vadd.f32 %v4735_v46, %v4734_v18 }
 0x3b7   : > { %2710 = vst [vmem:[%s4595_s27 + $0x20] sm:$0xff] %v2678_v53  ;;  %v2396_v56 = vadd.f32 %v2351_v55, %v1746_v8 }
 0x3b9   : > { %v2432_v39 = vadd.f32 %v4502_v48, %v2396_v56 }
 0x3ba   : > { %v2574_v13 = vpop.f32.mrf.mxu2 }
 0x3bb   : > { %v2464_v51 = vmax.f32 %v2432_v39, 0.0  ;;  %v2647_v40 = vadd.f32 %v3383_v32, %v2574_v13  ;;  %v2275_v39 = vadd.f32 %v2274_v28, %v2185_v45  ;;  %v2187_v32 = vpop.f32.mrf.mxu3 }
 0x3bc   : > { %v2353_v2 = vpop.f32.mrf.mxu1 }
 0x3bd   : > { %v2679_v1 = vmax.f32 %v2647_v40, 0.0  ;;  %v2484_v16 = vpack.c.bf16 %v2464_v51, %v2463_v33  ;;  %v2354_v58 = vadd.f32 %v2353_v2, %v2265_v36  ;;  %v2276_v51 = vpop.f32.mrf.mxu0 }
 0x3be   : > { %v2277_v36 = vadd.f32 %v2276_v51, %v2187_v32  ;;  %v3395_v32 = vld [vmem:[%s3492_s16 + $0x88] sm:$0xff] }
 0x3bf   : > { %2711 = vst [vmem:[%s4595_s27 + $0x28] sm:$0xff] %v2679_v1  ;;  %2616 = vmatmul.bf16.gmra.mxu2 %v2484_v16  ;;  %v2397_v12 = vadd.f32 %v2354_v58, %v4431_v3  ;;  %v3388_v16 = vld [vmem:[%s3492_s16 + $0x50] sm:$0xff] }
 0x3c1   : > { %v2433_v19 = vadd.f32 %v4502_v48, %v2397_v12 }
 0x3c2   : > { %v2577_v50 = vpop.f32.mrf.mxu2 }
 0x3c3   : > { %v2648_v54 = vadd.f32 %v3384_v57, %v2577_v50  ;;  %v2465_v3 = vmax.f32 %v2433_v19, 0.0  ;;  %v4737_v50 = vld [vmem:[#allocation9_spill] sm:$0xff] }
 0x3c4   : > { %v2355_v44 = vpop.f32.mrf.mxu1 }
 0x3c5   : > { %v2680_v63 = vmax.f32 %v2648_v54, 0.0  ;;  %v2356_v37 = vadd.f32 %v2355_v44, %v2267_v47  ;;  %v1761_v47 = vadd.f32 %v4737_v50, %v4736_v35  ;;  %v2190_v54 = vpop.f32.mrf.mxu3  ;;  %v2279_v44 = vpop.f32.mrf.mxu0  ;;  %v3397_v35 = vld [vmem:[%s3492_s16 + $0x98] sm:$0xff] }
 0x3c6   : > { %v2280_v19 = vadd.f32 %v2279_v44, %v2190_v54 }
 0x3c7   : > { %2712 = vst [vmem:[%s4595_s27 + $0x30] sm:$0xff] %v2680_v63  ;;  %v2398_v17 = vadd.f32 %v2356_v37, %v1751_v21 }
 0x3c9   : > { %v2434_v25 = vadd.f32 %v4502_v48, %v2398_v17 }
 0x3ca   : > { %v2579_v4 = vpop.f32.mrf.mxu2 }
 0x3cb   : > { %v2466_v26 = vmax.f32 %v2434_v25, 0.0  ;;  %v2649_v30 = vadd.f32 %v3385_v23, %v2579_v4 }
 0x3cc   : > { %v2358_v61 = vpop.f32.mrf.mxu1 }
 0x3cd   : > { %v2681_v10 = vmax.f32 %v2649_v30, 0.0  ;;  %v2485_v14 = vpack.c.bf16 %v2466_v26, %v2465_v3  ;;  %v2359_v27 = vadd.f32 %v2358_v61, %v2270_v60  ;;  %v2192_v23 = vpop.f32.mrf.mxu3  ;;  %v2281_v30 = vpop.f32.mrf.mxu0 }
 0x3ce   : > { %v2282_v60 = vadd.f32 %v2281_v30, %v2192_v23  ;;  %v3402_v23 = vld [vmem:[%s3492_s16 + $0xc0] sm:$0xff] }
 0x3cf   : > { %2713 = vst [vmem:[%s4595_s27 + $0x38] sm:$0xff] %v2681_v10  ;;  %2621 = vmatmul.bf16.gmra.mxu2 %v2485_v14  ;;  %v2399_v49 = vadd.f32 %v2359_v27, %v4733_v38  ;;  %v4738_v10 = vld [vmem:[#allocation12_spill] sm:$0xff]  ;;  %v3390_v27 = vld [vmem:[%s3492_s16 + $0x60] sm:$0xff] }
 0x3d1   : > { %v2435_v34 = vadd.f32 %v4502_v48, %v2399_v49 }
 0x3d2   : > { %v2582_v52 = vpop.f32.mrf.mxu2 }
 0x3d3   : > { %v2650_v7 = vadd.f32 %v3386_v41, %v2582_v52  ;;  %v2467_v53 = vmax.f32 %v2435_v34, 0.0 }
 0x3d4   : > { %v2360_v43 = vpop.f32.mrf.mxu1 }
 0x3d5   : > { %v2682_v29 = vmax.f32 %v2650_v7, 0.0  ;;  %v2361_v24 = vadd.f32 %v2360_v43, %v2272_v59  ;;  %v4739_v59 = vld [vmem:[#allocation13_spill] sm:$0xff] }
 0x3d6   : > { %v1766_v38 = vadd.f32 %v4586_v31, %v4739_v59 }
 0x3d7   : > { %2714 = vst [vmem:[%s4595_s27 + $0x40] sm:$0xff] %v2682_v29  ;;  %v2400_v62 = vadd.f32 %v2361_v24, %v1756_v11  ;;  %v3391_v29 = vld [vmem:[%s3492_s16 + $0x68] sm:$0xff] }
 0x3d9   : > { %v2436_v8 = vadd.f32 %v4502_v48, %v2400_v62 }
 0x3da   : > { %v2584_v6 = vpop.f32.mrf.mxu2 }
 0x3db   : > { %v2468_v55 = vmax.f32 %v2436_v8, 0.0  ;;  %v2651_v15 = vadd.f32 %v3387_v42, %v2584_v6  ;;  %v3392_v8 = vld [vmem:[%s3492_s16 + $0x70] sm:$0xff] }
 0x3dc   : > { %v2363_v56 = vpop.f32.mrf.mxu1 }
 0x3dd   : > { %v2683_v13 = vmax.f32 %v2651_v15, 0.0  ;;  %v2486_v33 = vpack.c.bf16 %v2468_v55, %v2467_v53  ;;  %v2364_v40 = vadd.f32 %v2363_v56, %v2275_v39  ;;  %v3393_v55 = vld [vmem:[%s3492_s16 + $0x78] sm:$0xff]  ;;  %v3394_v39 = vld [vmem:[%s3492_s16 + $0x80] sm:$0xff] }
 0x3df   : > { %2715 = vst [vmem:[%s4595_s27 + $0x48] sm:$0xff] %v2683_v13  ;;  %2626 = vmatmul.bf16.gmra.mxu2 %v2486_v33  ;;  %v2401_v1 = vadd.f32 %v2364_v40, %v4465_v22 }
 0x3e1   : > { %v2437_v5 = vadd.f32 %v4502_v48, %v2401_v1  ;;  %v3396_v1 = vld [vmem:[%s3492_s16 + $0x90] sm:$0xff] }
 0x3e2   : > { %v2587_v2 = vpop.f32.mrf.mxu2 }
 0x3e3   : > { %v2652_v0 = vadd.f32 %v3388_v16, %v2587_v2  ;;  %v2469_v22 = vmax.f32 %v2437_v5, 0.0 }
 0x3e4   : > { %v2365_v58 = vpop.f32.mrf.mxu1 }
 0x3e5   : > { %v2684_v12 = vmax.f32 %v2652_v0, 0.0  ;;  %v2366_v57 = vadd.f32 %v2365_v58, %v2277_v36 }
 0x3e7   : > { %2716 = vst [vmem:[%s4595_s27 + $0x50] sm:$0xff] %v2684_v12  ;;  %v2402_v21 = vadd.f32 %v2366_v57, %v1761_v47  ;;  %v3398_v57 = vld [vmem:[%s3492_s16 + $0xa0] sm:$0xff] }
 0x3e9   : > { %v2438_v63 = vadd.f32 %v4502_v48, %v2402_v21  ;;  %v3399_v21 = vld [vmem:[%s3492_s16 + $0xa8] sm:$0xff] }
 0x3ea   : > { %v2589_v37 = vpop.f32.mrf.mxu2 }
 0x3eb   : > { %v2470_v17 = vmax.f32 %v2438_v63, 0.0  ;;  %v2653_v25 = vadd.f32 %v3389_v9, %v2589_v37 }
 0x3ec   : > { %v2368_v20 = vpop.f32.mrf.mxu1 }
 0x3ed   : > { %v2685_v4 = vmax.f32 %v2653_v25, 0.0  ;;  %v2487_v3 = vpack.c.bf16 %v2470_v17, %v2469_v22  ;;  %v2369_v26 = vadd.f32 %v2368_v20, %v2280_v19  ;;  %v3400_v19 = vld [vmem:[%s3492_s16 + $0xb0] sm:$0xff]  ;;  %v3401_v20 = vld [vmem:[%s3492_s16 + $0xb8] sm:$0xff] }
 0x3ef   : > { %2717 = vst [vmem:[%s4595_s27 + $0x58] sm:$0xff] %v2685_v4  ;;  %2631 = vmatmul.bf16.gmra.mxu2 %v2487_v3  ;;  %v2403_v14 = vadd.f32 %v2369_v26, %v4738_v10  ;;  %v3403_v10 = vld [vmem:[%s3492_s16 + $0xc8] sm:$0xff] }
 0x3f1   : > { %v2439_v7 = vadd.f32 %v4502_v48, %v2403_v14 }
 0x3f2   : > { %v2592_v61 = vpop.f32.mrf.mxu2 }
 0x3f3   : > { %v2654_v52 = vadd.f32 %v3390_v27, %v2592_v61  ;;  %v2471_v46 = vmax.f32 %v2439_v7, 0.0 }
 0x3f4   : > { %v2370_v28 = vpop.f32.mrf.mxu1 }
 0x3f5   : > { %v2686_v49 = vmax.f32 %v2654_v52, 0.0  ;;  %v2371_v41 = vadd.f32 %v2370_v28, %v2282_v60  ;;  %v3404_v28 = vld [vmem:[%s3492_s16 + $0xd0] sm:$0xff] }
 0x3f7   : > { %2718 = vst [vmem:[%s4595_s27 + $0x60] sm:$0xff] %v2686_v49  ;;  %v2404_v45 = vadd.f32 %v2371_v41, %v1766_v38  ;;  %v3405_v41 = vld [vmem:[%s3492_s16 + $0xd8] sm:$0xff] }
 0x3f9   : > { %v2440_v43 = vadd.f32 %v4502_v48, %v2404_v45 }
 0x3fa   : > { %v2594_v18 = vpop.f32.mrf.mxu2 }
 0x3fb   : > { %v2472_v11 = vmax.f32 %v2440_v43, 0.0  ;;  %v2655_v24 = vadd.f32 %v3391_v29, %v2594_v18  ;;  %v3406_v18 = vld [vmem:[%s3492_s16 + $0xe0] sm:$0xff] }
 0x3fd   : > { %v2687_v34 = vmax.f32 %v2655_v24, 0.0  ;;  %v2488_v31 = vpack.c.bf16 %v2472_v11, %v2471_v46  ;;  %v3407_v24 = vld [vmem:[%s3492_s16 + $0xe8] sm:$0xff] }
 0x3ff   : > { %2719 = vst [vmem:[%s4595_s27 + $0x68] sm:$0xff] %v2687_v34  ;;  %2636 = vmatmul.bf16.gmra.mxu2 %v2488_v31 }
 0x402   : > { %v2597_v62 = vpop.f32.mrf.mxu2 }
 0x403   : > { %v2656_v6 = vadd.f32 %v3392_v8, %v2597_v62  ;;  %v3408_v8 = vld [vmem:[%s3492_s16 + $0xf0] sm:$0xff] }
 0x405   : > { %v2688_v53 = vmax.f32 %v2656_v6, 0.0 }
 0x407   : > { %2720 = vst [vmem:[%s4595_s27 + $0x70] sm:$0xff] %v2688_v53 }
 0x40a   : > { %v2599_v48 = vpop.f32.mrf.mxu2 }
 0x40b   : > { %v2657_v42 = vadd.f32 %v3393_v55, %v2599_v48  ;;  %v3409_v55 = vld [vmem:[%s3492_s16 + $0xf8] sm:$0xff] }
 0x40d   : > { %v2689_v15 = vmax.f32 %v2657_v42, 0.0 }
 0x40f   : > { %2721 = vst [vmem:[%s4595_s27 + $0x78] sm:$0xff] %v2689_v15 }
 0x412   : > { %v2602_v56 = vpop.f32.mrf.mxu2 }
 0x413   : > { %v2658_v13 = vadd.f32 %v3394_v39, %v2602_v56 }
 0x415   : > { %v2690_v33 = vmax.f32 %v2658_v13, 0.0 }
 0x417   : > { %2722 = vst [vmem:[%s4595_s27 + $0x80] sm:$0xff] %v2690_v33 }
 0x41a   : > { %v2604_v51 = vpop.f32.mrf.mxu2 }
 0x41b   : > { %v2659_v40 = vadd.f32 %v3395_v32, %v2604_v51 }
 0x41d   : > { %v2691_v2 = vmax.f32 %v2659_v40, 0.0 }
 0x41f   : > { %2723 = vst [vmem:[%s4595_s27 + $0x88] sm:$0xff] %v2691_v2 }
 0x422   : > { %v2607_v36 = vpop.f32.mrf.mxu2 }
 0x423   : > { %v2660_v16 = vadd.f32 %v3396_v1, %v2607_v36 }
 0x425   : > { %v2692_v0 = vmax.f32 %v2660_v16, 0.0 }
 0x427   : > { %2724 = vst [vmem:[%s4595_s27 + $0x90] sm:$0xff] %v2692_v0 }
 0x42a   : > { %v2609_v58 = vpop.f32.mrf.mxu2 }
 0x42b   : > { %v2661_v50 = vadd.f32 %v3397_v35, %v2609_v58 }
 0x42d   : > { %v2693_v47 = vmax.f32 %v2661_v50, 0.0 }
 0x42f   : > { %2725 = vst [vmem:[%s4595_s27 + $0x98] sm:$0xff] %v2693_v47 }
 0x432   : > { %v2612_v12 = vpop.f32.mrf.mxu2 }
 0x433   : > { %v2662_v54 = vadd.f32 %v3398_v57, %v2612_v12 }
 0x435   : > { %v2694_v44 = vmax.f32 %v2662_v54, 0.0 }
 0x437   : > { %2726 = vst [vmem:[%s4595_s27 + $0xa0] sm:$0xff] %v2694_v44 }
 0x43a   : > { %v2614_v5 = vpop.f32.mrf.mxu2 }
 0x43b   : > { %v2663_v63 = vadd.f32 %v3399_v21, %v2614_v5 }
 0x43d   : > { %v2695_v37 = vmax.f32 %v2663_v63, 0.0 }
 0x43f   : > { %2727 = vst [vmem:[%s4595_s27 + $0xa8] sm:$0xff] %v2695_v37 }
 0x442   : > { %v2617_v22 = vpop.f32.mrf.mxu2 }
 0x443   : > { %v2664_v17 = vadd.f32 %v3400_v19, %v2617_v22 }
 0x445   : > { %v2696_v9 = vmax.f32 %v2664_v17, 0.0 }
 0x447   : > { %2728 = vst [vmem:[%s4595_s27 + $0xb0] sm:$0xff] %v2696_v9 }
 0x44a   : > { %v2619_v25 = vpop.f32.mrf.mxu2 }
 0x44b   : > { %v2665_v4 = vadd.f32 %v3401_v20, %v2619_v25 }
 0x44d   : > { %v2697_v3 = vmax.f32 %v2665_v4, 0.0 }
 0x44f   : > { %2729 = vst [vmem:[%s4595_s27 + $0xb8] sm:$0xff] %v2697_v3 }
 0x452   : > { %v2622_v26 = vpop.f32.mrf.mxu2 }
 0x453   : > { %v2666_v30 = vadd.f32 %v3402_v23, %v2622_v26 }
 0x455   : > { %v2698_v61 = vmax.f32 %v2666_v30, 0.0 }
 0x457   : > { %2730 = vst [vmem:[%s4595_s27 + $0xc0] sm:$0xff] %v2698_v61 }
 0x45a   : > { %v2624_v60 = vpop.f32.mrf.mxu2 }
 0x45b   : > { %v2667_v14 = vadd.f32 %v3403_v10, %v2624_v60 }
 0x45d   : > { %v2699_v27 = vmax.f32 %v2667_v14, 0.0 }
 0x45f   : > { %2731 = vst [vmem:[%s4595_s27 + $0xc8] sm:$0xff] %v2699_v27 }
 0x462   : > { %v2627_v52 = vpop.f32.mrf.mxu2 }
 0x463   : > { %v2668_v59 = vadd.f32 %v3404_v28, %v2627_v52 }
 0x465   : > { %v2700_v38 = vmax.f32 %v2668_v59, 0.0 }
 0x467   : > { %2732 = vst [vmem:[%s4595_s27 + $0xd0] sm:$0xff] %v2700_v38 }
 0x46a   : > { %v2629_v49 = vpop.f32.mrf.mxu2 }
 0x46b   : > { %v2669_v7 = vadd.f32 %v3405_v41, %v2629_v49 }
 0x46d   : > { %v2701_v45 = vmax.f32 %v2669_v7, 0.0 }
 0x46f   : > { %2733 = vst [vmem:[%s4595_s27 + $0xd8] sm:$0xff] %v2701_v45 }
 0x472   : > { %v2632_v43 = vpop.f32.mrf.mxu2 }
 0x473   : > { %v2670_v46 = vadd.f32 %v3406_v18, %v2632_v43 }
 0x475   : > { %v2702_v11 = vmax.f32 %v2670_v46, 0.0 }
 0x477   : > { %2734 = vst [vmem:[%s4595_s27 + $0xe0] sm:$0xff] %v2702_v11 }
 0x47a   : > { %v2634_v29 = vpop.f32.mrf.mxu2 }
 0x47b   : > { %v2671_v34 = vadd.f32 %v3407_v24, %v2634_v29 }
 0x47d   : > { %v2703_v31 = vmax.f32 %v2671_v34, 0.0 }
 0x47f   : > { %2735 = vst [vmem:[%s4595_s27 + $0xe8] sm:$0xff] %v2703_v31 }
 0x482   : > { %v2637_v62 = vpop.f32.mrf.mxu2 }
 0x483   : > { %v2672_v6 = vadd.f32 %v3408_v8, %v2637_v62 }
 0x485   : > { %v2704_v53 = vmax.f32 %v2672_v6, 0.0 }
 0x487   : > { %2736 = vst [vmem:[%s4595_s27 + $0xf0] sm:$0xff] %v2704_v53 }
 0x48a   : > { %v2639_v48 = vpop.f32.mrf.mxu2 }
 0x48b   : > { %v2673_v42 = vadd.f32 %v3409_v55, %v2639_v48 }
 0x48d   : > { %v2705_v15 = vmax.f32 %v2673_v42, 0.0 }
 0x48f   : > { %2737 = vst [vmem:[%s4595_s27 + $0xf8] sm:$0xff] %v2705_v15 }
 0x490 PF: > { %s16_s21 = sadd.s32 1, %s3416_s21  }
 0x491   : > { %p13_p4 = scmp.ge.s32.totalorder %s16_s21, 4  }
 0x493   :  { %15 = sbr.rel (!%p13_p4) target bundleno = 1 (0x1), region = 79 }

</bundles_post_ra>
